<compile_context>
chip_gen: v7x
topology: tpu7x:2x2x1
jax: 0.10.0
libtpu: 0.0.40
codegen_flags: <defaults>
</compile_context>

<pallas_src>
import functools
import math

import jax
import jax.numpy as jnp
from jax import lax
from jax.experimental import pallas as pl
from jax.experimental.pallas import tpu as pltpu

SUBLANES = 8  # pad batch to a multiple of the sublane count


# ------------------------------------------------------------------ #
# Fused kernel: all LSTM layers + head, time loop inside the kernel
# ------------------------------------------------------------------ #
def _make_fused_lstm_kernel(num_layers, hidden_dim, seq_len):
    def kernel(*refs):
        # refs = [x, (w_l, b_l) * num_layers, fc_w, fc_b, logits_out, emb_out]
        x_ref = refs[0]                                           # (seq, batch, feat)
        layer_w = [refs[1 + 2 * l][...] for l in range(num_layers)]   # (in_l + H, 4H)
        layer_b = [refs[2 + 2 * l][...] for l in range(num_layers)]   # (1, 4H)
        fc_w = refs[1 + 2 * num_layers][...]                      # (H, C) pre-transposed
        fc_b = refs[2 + 2 * num_layers][...]                      # (1, C)
        logits_ref = refs[3 + 2 * num_layers]
        emb_ref = refs[4 + 2 * num_layers]

        batch = x_ref.shape[1]
        H = hidden_dim

        def step(t, carry):
            hs, cs = carry
            inp = x_ref[t]                                        # (batch, feat_l)
            new_hs, new_cs = [], []
            for l in range(num_layers):
                # single fused gate matmul on [x_t, h_prev] with stacked [W_ih; W_hh]^T
                xh = jnp.concatenate([inp, hs[l]], axis=-1)
                gates = (
                    jnp.dot(xh.astype(layer_w[l].dtype), layer_w[l],
                            preferred_element_type=jnp.float32)
                    + layer_b[l]
                )                                                 # (batch, 4H)
                sig = jax.nn.sigmoid(gates)        # one full-vreg sigmoid (i, f, o)
                i_g = sig[:, 0 * H:1 * H]
                f_g = sig[:, 1 * H:2 * H]
                o_g = sig[:, 3 * H:4 * H]
                g_g = jnp.tanh(gates[:, 2 * H:3 * H])
                c_new = f_g * cs[l] + i_g * g_g
                h_new = o_g * jnp.tanh(c_new)
                new_hs.append(h_new)
                new_cs.append(c_new)
                inp = h_new
            return tuple(new_hs), tuple(new_cs)

        zeros = tuple(jnp.zeros((batch, H), jnp.float32) for _ in range(num_layers))
        hs, _ = lax.fori_loop(0, seq_len, step, (zeros, zeros), unroll=True)

        # TODO(synk): nn.Dropout in training mode would need PRNG masking; here it is
        # eval-mode identity, so embedding = relu(h_last).
        emb = jnp.maximum(hs[-1], 0.0)
        emb_ref[...] = emb.astype(emb_ref.dtype)
        logits_ref[...] = (
            jnp.dot(emb.astype(fc_w.dtype), fc_w, preferred_element_type=jnp.float32)
            + fc_b
        ).astype(logits_ref.dtype)

    return kernel


# ------------------------------------------------------------------ #
# Wrapper: single layout change + batch padding, one pallas_call
# ------------------------------------------------------------------ #
def model_forward(params, inputs, *, hidden_dim, num_layers):
    """inputs: (batch, seq, num_nodes, input_dim) -> (logits, embedding)."""
    b, s, n, d = inputs.shape
    feat = n * d
    # Single layout change: (b, s, n, d) -> (s, b, n*d).  PyTorch's permute(0,1,3,2)
    # is folded into the layer-0 weight row permutation (done once in prepare_params).
    x = jnp.transpose(inputs.reshape(b, s, feat), (1, 0, 2))
    # Pad batch to a sublane multiple so h/c/gates use full vregs & MXU rows.
    b_pad = max(SUBLANES, ((b + SUBLANES - 1) // SUBLANES) * SUBLANES)
    if b_pad != b:
        x = jnp.pad(x, ((0, 0), (0, b_pad - b), (0, 0)))

    H = hidden_dim
    n_classes = params["fc_w"].shape[1]

    kernel = _make_fused_lstm_kernel(num_layers, H, s)

    in_specs = [pl.BlockSpec((s, b_pad, feat), lambda i: (0, 0, 0))]
    operands = [x]
    for l in range(num_layers):
        w = params["lstm"][l]["w"]
        bias = params["lstm"][l]["b"]
        in_specs.append(pl.BlockSpec(w.shape, lambda i: (0, 0)))
        in_specs.append(pl.BlockSpec(bias.shape, lambda i: (0, 0)))
        operands += [w, bias]
    in_specs.append(pl.BlockSpec(params["fc_w"].shape, lambda i: (0, 0)))
    in_specs.append(pl.BlockSpec(params["fc_b"].shape, lambda i: (0, 0)))
    operands += [params["fc_w"], params["fc_b"]]

    logits_pad, emb_pad = pl.pallas_call(
        kernel,
        out_shape=(
            jax.ShapeDtypeStruct((b_pad, n_classes), jnp.float32),
            jax.ShapeDtypeStruct((b_pad, H), jnp.float32),
        ),
        grid_spec=pltpu.PrefetchScalarGridSpec(
            num_scalar_prefetch=0,
            grid=(1,),
            in_specs=in_specs,
            out_specs=[
                pl.BlockSpec((b_pad, n_classes), lambda i: (0, 0)),
                pl.BlockSpec((b_pad, H), lambda i: (0, 0)),
            ],
        ),
        compiler_params=pltpu.CompilerParams(
            dimension_semantics=("arbitrary",),
            vmem_limit_bytes=32 * 1024 * 1024,
        ),
    )(*operands)

    return logits_pad[:b], emb_pad[:b]


# ------------------------------------------------------------------ #
# Params: raw (PyTorch-equivalent) init + one-time fusion / re-layout
# ------------------------------------------------------------------ #
def init_raw_params(key, input_dim, num_nodes, hidden_dim, num_layers, n_classes):
    """Mirrors nn.LSTM / nn.Linear default uniform init (raw layout)."""
    k = 1.0 / math.sqrt(hidden_dim)
    in_feat = input_dim * num_nodes
    raw = {"lstm": []}
    for layer in range(num_layers):
        key, k1, k2, k3, k4 = jax.random.split(key, 5)
        lin = in_feat if layer == 0 else hidden_dim
        raw["lstm"].append({
            "w_ih": jax.random.uniform(k1, (4 * hidden_dim, lin), jnp.float32, -k, k),
            "w_hh": jax.random.uniform(k2, (4 * hidden_dim, hidden_dim), jnp.float32, -k, k),
            "b_ih": jax.random.uniform(k3, (4 * hidden_dim,), jnp.float32, -k, k),
            "b_hh": jax.random.uniform(k4, (4 * hidden_dim,), jnp.float32, -k, k),
        })
    key, k5, k6 = jax.random.split(key, 3)
    raw["fc_w"] = jax.random.uniform(k5, (n_classes, hidden_dim), jnp.float32, -k, k)
    raw["fc_b"] = jax.random.uniform(k6, (n_classes,), jnp.float32, -k, k)
    return raw


def prepare_params(raw, input_dim, num_nodes, compute_dtype=jnp.float32):
    """One-time host-side weight massaging:
       - transpose + stack [W_ih; W_hh] -> (in_l + H, 4H)  (one MXU matmul / step)
       - fold PyTorch's permute(0,1,3,2) into a layer-0 weight row permutation
       - fuse biases b_ih + b_hh
       - pre-transpose the FC weight to (H, n_classes)
       compute_dtype=jnp.bfloat16 recommended on v6e/v7x at large hidden sizes."""
    params = {"lstm": []}
    # new_row[n*D + d] = old_row[d*N + n]
    perm = (jnp.arange(input_dim)[None, :] * num_nodes
            + jnp.arange(num_nodes)[:, None]).reshape(-1)
    for l, lp in enumerate(raw["lstm"]):
        w_ih_t = lp["w_ih"].T                       # (in_l, 4H)
        if l == 0:
            w_ih_t = w_ih_t[perm]
        w = jnp.concatenate([w_ih_t, lp["w_hh"].T], axis=0).astype(compute_dtype)
        b = (lp["b_ih"] + lp["b_hh"]).reshape(1, -1).astype(jnp.float32)
        params["lstm"].append({"w": w, "b": b})
    params["fc_w"] = raw["fc_w"].T.astype(compute_dtype)      # (H, C)
    params["fc_b"] = raw["fc_b"].reshape(1, -1).astype(jnp.float32)
    return params


# ------------------------------------------------------------------ #
# Pure-JAX reference of the PyTorch forward (for correctness check)
# ------------------------------------------------------------------ #
def reference_forward(raw, inputs):
    b, s, n, d = inputs.shape
    x = jnp.transpose(inputs, (0, 1, 3, 2)).reshape(b, s, d * n)
    H = raw["lstm"][0]["w_hh"].shape[1]
    out = x
    for lp in raw["lstm"]:
        h = jnp.zeros((b, H), jnp.float32)
        c = jnp.zeros((b, H), jnp.float32)
        ys = []
        for t in range(s):
            gates = (out[:, t, :] @ lp["w_ih"].T + h @ lp["w_hh"].T
                     + lp["b_ih"] + lp["b_hh"])
            i_g = jax.nn.sigmoid(gates[:, 0 * H:1 * H])
            f_g = jax.nn.sigmoid(gates[:, 1 * H:2 * H])
            g_g = jnp.tanh(gates[:, 2 * H:3 * H])
            o_g = jax.nn.sigmoid(gates[:, 3 * H:4 * H])
            c = f_g * c + i_g * g_g
            h = o_g * jnp.tanh(c)
            ys.append(h)
        out = jnp.stack(ys, axis=1)
    h_last = out[:, -1, :]
    emb = jnp.maximum(h_last, 0.0)
    logits = emb @ raw["fc_w"].T + raw["fc_b"]
    return logits, emb


if __name__ == "__main__":
    import numpy as np

    batch, seq_len = 2, 8
    num_nodes, input_dim = 4, 4
    hidden_dim, num_layers, n_classes = 32, 2, 5

    key = jax.random.PRNGKey(0)
    key, pk, xk = jax.random.split(key, 3)
    raw = init_raw_params(pk, input_dim, num_nodes, hidden_dim, num_layers, n_classes)
    params = prepare_params(raw, input_dim, num_nodes)
    inputs = jax.random.normal(xk, (batch, seq_len, num_nodes, input_dim), jnp.float32)

    fwd = jax.jit(functools.partial(model_forward,
                                    hidden_dim=hidden_dim, num_layers=num_layers))
    logits, embedding = fwd(params, inputs)
    jax.block_until_ready((logits, embedding))

    assert logits.shape == (batch, n_classes)
    assert embedding.shape == (batch, hidden_dim)

    ref_logits, ref_emb = reference_forward(raw, inputs)
    assert np.allclose(np.asarray(logits), np.asarray(ref_logits), atol=1e-3, rtol=1e-3)
    assert np.allclose(np.asarray(embedding), np.asarray(ref_emb), atol=1e-3, rtol=1e-3)

    print("KERNEL_OK")
</pallas_src>

<mosaic_0001>
module attributes {stable_mosaic.version = 11 : i64} {
  func.func @kernel(%arg0: i32, %arg1: memref<8x8x16xf32, #tpu.memory_space<vmem>>, %arg2: memref<48x128xf32, #tpu.memory_space<vmem>>, %arg3: memref<1x128xf32, #tpu.memory_space<vmem>>, %arg4: memref<64x128xf32, #tpu.memory_space<vmem>>, %arg5: memref<1x128xf32, #tpu.memory_space<vmem>>, %arg6: memref<32x5xf32, #tpu.memory_space<vmem>>, %arg7: memref<1x5xf32, #tpu.memory_space<vmem>>, %arg8: memref<8x5xf32, #tpu.memory_space<vmem>>, %arg9: memref<8x32xf32, #tpu.memory_space<vmem>>) attributes {dimension_semantics = [#tpu.dimension_semantics<arbitrary>], iteration_bounds = array<i64: 1>, scalar_prefetch = 0 : i64, scratch_operands = 0 : i64, tpu.core_type = #tpu.core_type<tc>, window_params = [{pipeline_mode = #tpu.pipeline_mode<synchronous>, transform_indices = @transform_0, window_bounds = array<i64: 8, 8, 16>}, {pipeline_mode = #tpu.pipeline_mode<synchronous>, transform_indices = @transform_1, window_bounds = array<i64: 48, 128>}, {pipeline_mode = #tpu.pipeline_mode<synchronous>, transform_indices = @transform_2, window_bounds = array<i64: 1, 128>}, {pipeline_mode = #tpu.pipeline_mode<synchronous>, transform_indices = @transform_3, window_bounds = array<i64: 64, 128>}, {pipeline_mode = #tpu.pipeline_mode<synchronous>, transform_indices = @transform_4, window_bounds = array<i64: 1, 128>}, {pipeline_mode = #tpu.pipeline_mode<synchronous>, transform_indices = @transform_5, window_bounds = array<i64: 32, 5>}, {pipeline_mode = #tpu.pipeline_mode<synchronous>, transform_indices = @transform_6, window_bounds = array<i64: 1, 5>}, {pipeline_mode = #tpu.pipeline_mode<synchronous>, transform_indices = @transform_7, window_bounds = array<i64: 8, 5>}, {pipeline_mode = #tpu.pipeline_mode<synchronous>, transform_indices = @transform_8, window_bounds = array<i64: 8, 32>}]} {
    %c0 = arith.constant 0 : index
    %c0_0 = arith.constant 0 : index
    %0 = vector.load %arg2[%c0, %c0_0] : memref<48x128xf32, #tpu.memory_space<vmem>>, vector<48x128xf32>
    %c0_1 = arith.constant 0 : index
    %c0_2 = arith.constant 0 : index
    %1 = vector.load %arg4[%c0_1, %c0_2] : memref<64x128xf32, #tpu.memory_space<vmem>>, vector<64x128xf32>
    %c0_3 = arith.constant 0 : index
    %c0_4 = arith.constant 0 : index
    %2 = vector.load %arg3[%c0_3, %c0_4] : memref<1x128xf32, #tpu.memory_space<vmem>>, vector<1x128xf32>
    %c0_5 = arith.constant 0 : index
    %c0_6 = arith.constant 0 : index
    %3 = vector.load %arg5[%c0_5, %c0_6] : memref<1x128xf32, #tpu.memory_space<vmem>>, vector<1x128xf32>
    %c0_7 = arith.constant 0 : index
    %c0_8 = arith.constant 0 : index
    %4 = vector.load %arg6[%c0_7, %c0_8] : memref<32x5xf32, #tpu.memory_space<vmem>>, vector<32x5xf32>
    %c0_9 = arith.constant 0 : index
    %c0_10 = arith.constant 0 : index
    %5 = vector.load %arg7[%c0_9, %c0_10] : memref<1x5xf32, #tpu.memory_space<vmem>>, vector<1x5xf32>
    %cst = arith.constant 0.000000e+00 : f32
    %6 = vector.broadcast %cst : f32 to vector<8x32xf32>
    %cst_11 = arith.constant 0.000000e+00 : f32
    %7 = vector.broadcast %cst_11 : f32 to vector<8x32xf32>
    %c0_i32 = arith.constant 0 : i32
    %8 = arith.index_cast %c0_i32 : i32 to index
    %c0_12 = arith.constant 0 : index
    %c0_13 = arith.constant 0 : index
    %9 = vector.load %arg1[%8, %c0_12, %c0_13] : memref<8x8x16xf32, #tpu.memory_space<vmem>>, vector<1x8x16xf32>
    %10 = vector.shape_cast %9 : vector<1x8x16xf32> to vector<8x16xf32>
    %11 = tpu.concatenate %10, %6 in 1 : vector<8x16xf32>, vector<8x32xf32> -> vector<8x48xf32>
    %cst_14 = arith.constant dense<0.000000e+00> : vector<8x128xf32>
    %12 = tpu.matmul %11, %0, %cst_14 {dimension_numbers = #tpu.dot_dimension_numbers<[1], [0], [0], [1], [0, 0, 1, 1], [], []>} : vector<8x48xf32>, vector<48x128xf32>, vector<8x128xf32> -> vector<8x128xf32>
    %13 = vector.broadcast %2 : vector<1x128xf32> to vector<8x128xf32>
    %14 = arith.addf %12, %13 : vector<8x128xf32>
    %15 = arith.negf %14 : vector<8x128xf32>
    %16 = math.exp %15 : vector<8x128xf32>
    %cst_15 = arith.constant 1.000000e+00 : f32
    %17 = vector.broadcast %cst_15 : f32 to vector<8x128xf32>
    %18 = arith.addf %17, %16 : vector<8x128xf32>
    %19 = arith.divf %17, %18 : vector<8x128xf32>
    %20 = vector.extract_strided_slice %19 {offsets = [0, 0], sizes = [8, 32], strides = [1, 1]} : vector<8x128xf32> to vector<8x32xf32>
    %21 = vector.extract_strided_slice %19 {offsets = [0, 32], sizes = [8, 32], strides = [1, 1]} : vector<8x128xf32> to vector<8x32xf32>
    %22 = vector.extract_strided_slice %19 {offsets = [0, 96], sizes = [8, 32], strides = [1, 1]} : vector<8x128xf32> to vector<8x32xf32>
    %23 = vector.extract_strided_slice %14 {offsets = [0, 64], sizes = [8, 32], strides = [1, 1]} : vector<8x128xf32> to vector<8x32xf32>
    %24 = math.tanh %23 : vector<8x32xf32>
    %25 = arith.mulf %21, %6 : vector<8x32xf32>
    %26 = arith.mulf %20, %24 : vector<8x32xf32>
    %27 = arith.addf %25, %26 : vector<8x32xf32>
    %28 = math.tanh %27 : vector<8x32xf32>
    %29 = arith.mulf %22, %28 : vector<8x32xf32>
    %30 = tpu.concatenate %29, %7 in 1 : vector<8x32xf32>, vector<8x32xf32> -> vector<8x64xf32>
    %cst_16 = arith.constant dense<0.000000e+00> : vector<8x128xf32>
    %31 = tpu.matmul %30, %1, %cst_16 {dimension_numbers = #tpu.dot_dimension_numbers<[1], [0], [0], [1], [0, 0, 1, 1], [], []>} : vector<8x64xf32>, vector<64x128xf32>, vector<8x128xf32> -> vector<8x128xf32>
    %32 = vector.broadcast %3 : vector<1x128xf32> to vector<8x128xf32>
    %33 = arith.addf %31, %32 : vector<8x128xf32>
    %34 = arith.negf %33 : vector<8x128xf32>
    %35 = math.exp %34 : vector<8x128xf32>
    %cst_17 = arith.constant 1.000000e+00 : f32
    %36 = vector.broadcast %cst_17 : f32 to vector<8x128xf32>
    %37 = arith.addf %36, %35 : vector<8x128xf32>
    %38 = arith.divf %36, %37 : vector<8x128xf32>
    %39 = vector.extract_strided_slice %38 {offsets = [0, 0], sizes = [8, 32], strides = [1, 1]} : vector<8x128xf32> to vector<8x32xf32>
    %40 = vector.extract_strided_slice %38 {offsets = [0, 32], sizes = [8, 32], strides = [1, 1]} : vector<8x128xf32> to vector<8x32xf32>
    %41 = vector.extract_strided_slice %38 {offsets = [0, 96], sizes = [8, 32], strides = [1, 1]} : vector<8x128xf32> to vector<8x32xf32>
    %42 = vector.extract_strided_slice %33 {offsets = [0, 64], sizes = [8, 32], strides = [1, 1]} : vector<8x128xf32> to vector<8x32xf32>
    %43 = math.tanh %42 : vector<8x32xf32>
    %44 = arith.mulf %40, %7 : vector<8x32xf32>
    %45 = arith.mulf %39, %43 : vector<8x32xf32>
    %46 = arith.addf %44, %45 : vector<8x32xf32>
    %47 = math.tanh %46 : vector<8x32xf32>
    %48 = arith.mulf %41, %47 : vector<8x32xf32>
    %c1_i32 = arith.constant 1 : i32
    %49 = arith.index_cast %c1_i32 : i32 to index
    %c0_18 = arith.constant 0 : index
    %c0_19 = arith.constant 0 : index
    %50 = vector.load %arg1[%49, %c0_18, %c0_19] : memref<8x8x16xf32, #tpu.memory_space<vmem>>, vector<1x8x16xf32>
    %51 = vector.shape_cast %50 : vector<1x8x16xf32> to vector<8x16xf32>
    %52 = tpu.concatenate %51, %29 in 1 : vector<8x16xf32>, vector<8x32xf32> -> vector<8x48xf32>
    %cst_20 = arith.constant dense<0.000000e+00> : vector<8x128xf32>
    %53 = tpu.matmul %52, %0, %cst_20 {dimension_numbers = #tpu.dot_dimension_numbers<[1], [0], [0], [1], [0, 0, 1, 1], [], []>} : vector<8x48xf32>, vector<48x128xf32>, vector<8x128xf32> -> vector<8x128xf32>
    %54 = vector.broadcast %2 : vector<1x128xf32> to vector<8x128xf32>
    %55 = arith.addf %53, %54 : vector<8x128xf32>
    %56 = arith.negf %55 : vector<8x128xf32>
    %57 = math.exp %56 : vector<8x128xf32>
    %cst_21 = arith.constant 1.000000e+00 : f32
    %58 = vector.broadcast %cst_21 : f32 to vector<8x128xf32>
    %59 = arith.addf %58, %57 : vector<8x128xf32>
    %60 = arith.divf %58, %59 : vector<8x128xf32>
    %61 = vector.extract_strided_slice %60 {offsets = [0, 0], sizes = [8, 32], strides = [1, 1]} : vector<8x128xf32> to vector<8x32xf32>
    %62 = vector.extract_strided_slice %60 {offsets = [0, 32], sizes = [8, 32], strides = [1, 1]} : vector<8x128xf32> to vector<8x32xf32>
    %63 = vector.extract_strided_slice %60 {offsets = [0, 96], sizes = [8, 32], strides = [1, 1]} : vector<8x128xf32> to vector<8x32xf32>
    %64 = vector.extract_strided_slice %55 {offsets = [0, 64], sizes = [8, 32], strides = [1, 1]} : vector<8x128xf32> to vector<8x32xf32>
    %65 = math.tanh %64 : vector<8x32xf32>
    %66 = arith.mulf %62, %27 : vector<8x32xf32>
    %67 = arith.mulf %61, %65 : vector<8x32xf32>
    %68 = arith.addf %66, %67 : vector<8x32xf32>
    %69 = math.tanh %68 : vector<8x32xf32>
    %70 = arith.mulf %63, %69 : vector<8x32xf32>
    %71 = tpu.concatenate %70, %48 in 1 : vector<8x32xf32>, vector<8x32xf32> -> vector<8x64xf32>
    %cst_22 = arith.constant dense<0.000000e+00> : vector<8x128xf32>
    %72 = tpu.matmul %71, %1, %cst_22 {dimension_numbers = #tpu.dot_dimension_numbers<[1], [0], [0], [1], [0, 0, 1, 1], [], []>} : vector<8x64xf32>, vector<64x128xf32>, vector<8x128xf32> -> vector<8x128xf32>
    %73 = vector.broadcast %3 : vector<1x128xf32> to vector<8x128xf32>
    %74 = arith.addf %72, %73 : vector<8x128xf32>
    %75 = arith.negf %74 : vector<8x128xf32>
    %76 = math.exp %75 : vector<8x128xf32>
    %cst_23 = arith.constant 1.000000e+00 : f32
    %77 = vector.broadcast %cst_23 : f32 to vector<8x128xf32>
    %78 = arith.addf %77, %76 : vector<8x128xf32>
    %79 = arith.divf %77, %78 : vector<8x128xf32>
    %80 = vector.extract_strided_slice %79 {offsets = [0, 0], sizes = [8, 32], strides = [1, 1]} : vector<8x128xf32> to vector<8x32xf32>
    %81 = vector.extract_strided_slice %79 {offsets = [0, 32], sizes = [8, 32], strides = [1, 1]} : vector<8x128xf32> to vector<8x32xf32>
    %82 = vector.extract_strided_slice %79 {offsets = [0, 96], sizes = [8, 32], strides = [1, 1]} : vector<8x128xf32> to vector<8x32xf32>
    %83 = vector.extract_strided_slice %74 {offsets = [0, 64], sizes = [8, 32], strides = [1, 1]} : vector<8x128xf32> to vector<8x32xf32>
    %84 = math.tanh %83 : vector<8x32xf32>
    %85 = arith.mulf %81, %46 : vector<8x32xf32>
    %86 = arith.mulf %80, %84 : vector<8x32xf32>
    %87 = arith.addf %85, %86 : vector<8x32xf32>
    %88 = math.tanh %87 : vector<8x32xf32>
    %89 = arith.mulf %82, %88 : vector<8x32xf32>
    %c2_i32 = arith.constant 2 : i32
    %90 = arith.index_cast %c2_i32 : i32 to index
    %c0_24 = arith.constant 0 : index
    %c0_25 = arith.constant 0 : index
    %91 = vector.load %arg1[%90, %c0_24, %c0_25] : memref<8x8x16xf32, #tpu.memory_space<vmem>>, vector<1x8x16xf32>
    %92 = vector.shape_cast %91 : vector<1x8x16xf32> to vector<8x16xf32>
    %93 = tpu.concatenate %92, %70 in 1 : vector<8x16xf32>, vector<8x32xf32> -> vector<8x48xf32>
    %cst_26 = arith.constant dense<0.000000e+00> : vector<8x128xf32>
    %94 = tpu.matmul %93, %0, %cst_26 {dimension_numbers = #tpu.dot_dimension_numbers<[1], [0], [0], [1], [0, 0, 1, 1], [], []>} : vector<8x48xf32>, vector<48x128xf32>, vector<8x128xf32> -> vector<8x128xf32>
    %95 = vector.broadcast %2 : vector<1x128xf32> to vector<8x128xf32>
    %96 = arith.addf %94, %95 : vector<8x128xf32>
    %97 = arith.negf %96 : vector<8x128xf32>
    %98 = math.exp %97 : vector<8x128xf32>
    %cst_27 = arith.constant 1.000000e+00 : f32
    %99 = vector.broadcast %cst_27 : f32 to vector<8x128xf32>
    %100 = arith.addf %99, %98 : vector<8x128xf32>
    %101 = arith.divf %99, %100 : vector<8x128xf32>
    %102 = vector.extract_strided_slice %101 {offsets = [0, 0], sizes = [8, 32], strides = [1, 1]} : vector<8x128xf32> to vector<8x32xf32>
    %103 = vector.extract_strided_slice %101 {offsets = [0, 32], sizes = [8, 32], strides = [1, 1]} : vector<8x128xf32> to vector<8x32xf32>
    %104 = vector.extract_strided_slice %101 {offsets = [0, 96], sizes = [8, 32], strides = [1, 1]} : vector<8x128xf32> to vector<8x32xf32>
    %105 = vector.extract_strided_slice %96 {offsets = [0, 64], sizes = [8, 32], strides = [1, 1]} : vector<8x128xf32> to vector<8x32xf32>
    %106 = math.tanh %105 : vector<8x32xf32>
    %107 = arith.mulf %103, %68 : vector<8x32xf32>
    %108 = arith.mulf %102, %106 : vector<8x32xf32>
    %109 = arith.addf %107, %108 : vector<8x32xf32>
    %110 = math.tanh %109 : vector<8x32xf32>
    %111 = arith.mulf %104, %110 : vector<8x32xf32>
    %112 = tpu.concatenate %111, %89 in 1 : vector<8x32xf32>, vector<8x32xf32> -> vector<8x64xf32>
    %cst_28 = arith.constant dense<0.000000e+00> : vector<8x128xf32>
    %113 = tpu.matmul %112, %1, %cst_28 {dimension_numbers = #tpu.dot_dimension_numbers<[1], [0], [0], [1], [0, 0, 1, 1], [], []>} : vector<8x64xf32>, vector<64x128xf32>, vector<8x128xf32> -> vector<8x128xf32>
    %114 = vector.broadcast %3 : vector<1x128xf32> to vector<8x128xf32>
    %115 = arith.addf %113, %114 : vector<8x128xf32>
    %116 = arith.negf %115 : vector<8x128xf32>
    %117 = math.exp %116 : vector<8x128xf32>
    %cst_29 = arith.constant 1.000000e+00 : f32
    %118 = vector.broadcast %cst_29 : f32 to vector<8x128xf32>
    %119 = arith.addf %118, %117 : vector<8x128xf32>
    %120 = arith.divf %118, %119 : vector<8x128xf32>
    %121 = vector.extract_strided_slice %120 {offsets = [0, 0], sizes = [8, 32], strides = [1, 1]} : vector<8x128xf32> to vector<8x32xf32>
    %122 = vector.extract_strided_slice %120 {offsets = [0, 32], sizes = [8, 32], strides = [1, 1]} : vector<8x128xf32> to vector<8x32xf32>
    %123 = vector.extract_strided_slice %120 {offsets = [0, 96], sizes = [8, 32], strides = [1, 1]} : vector<8x128xf32> to vector<8x32xf32>
    %124 = vector.extract_strided_slice %115 {offsets = [0, 64], sizes = [8, 32], strides = [1, 1]} : vector<8x128xf32> to vector<8x32xf32>
    %125 = math.tanh %124 : vector<8x32xf32>
    %126 = arith.mulf %122, %87 : vector<8x32xf32>
    %127 = arith.mulf %121, %125 : vector<8x32xf32>
    %128 = arith.addf %126, %127 : vector<8x32xf32>
    %129 = math.tanh %128 : vector<8x32xf32>
    %130 = arith.mulf %123, %129 : vector<8x32xf32>
    %c3_i32 = arith.constant 3 : i32
    %131 = arith.index_cast %c3_i32 : i32 to index
    %c0_30 = arith.constant 0 : index
    %c0_31 = arith.constant 0 : index
    %132 = vector.load %arg1[%131, %c0_30, %c0_31] : memref<8x8x16xf32, #tpu.memory_space<vmem>>, vector<1x8x16xf32>
    %133 = vector.shape_cast %132 : vector<1x8x16xf32> to vector<8x16xf32>
    %134 = tpu.concatenate %133, %111 in 1 : vector<8x16xf32>, vector<8x32xf32> -> vector<8x48xf32>
    %cst_32 = arith.constant dense<0.000000e+00> : vector<8x128xf32>
    %135 = tpu.matmul %134, %0, %cst_32 {dimension_numbers = #tpu.dot_dimension_numbers<[1], [0], [0], [1], [0, 0, 1, 1], [], []>} : vector<8x48xf32>, vector<48x128xf32>, vector<8x128xf32> -> vector<8x128xf32>
    %136 = vector.broadcast %2 : vector<1x128xf32> to vector<8x128xf32>
    %137 = arith.addf %135, %136 : vector<8x128xf32>
    %138 = arith.negf %137 : vector<8x128xf32>
    %139 = math.exp %138 : vector<8x128xf32>
    %cst_33 = arith.constant 1.000000e+00 : f32
    %140 = vector.broadcast %cst_33 : f32 to vector<8x128xf32>
    %141 = arith.addf %140, %139 : vector<8x128xf32>
    %142 = arith.divf %140, %141 : vector<8x128xf32>
    %143 = vector.extract_strided_slice %142 {offsets = [0, 0], sizes = [8, 32], strides = [1, 1]} : vector<8x128xf32> to vector<8x32xf32>
    %144 = vector.extract_strided_slice %142 {offsets = [0, 32], sizes = [8, 32], strides = [1, 1]} : vector<8x128xf32> to vector<8x32xf32>
    %145 = vector.extract_strided_slice %142 {offsets = [0, 96], sizes = [8, 32], strides = [1, 1]} : vector<8x128xf32> to vector<8x32xf32>
    %146 = vector.extract_strided_slice %137 {offsets = [0, 64], sizes = [8, 32], strides = [1, 1]} : vector<8x128xf32> to vector<8x32xf32>
    %147 = math.tanh %146 : vector<8x32xf32>
    %148 = arith.mulf %144, %109 : vector<8x32xf32>
    %149 = arith.mulf %143, %147 : vector<8x32xf32>
    %150 = arith.addf %148, %149 : vector<8x32xf32>
    %151 = math.tanh %150 : vector<8x32xf32>
    %152 = arith.mulf %145, %151 : vector<8x32xf32>
    %153 = tpu.concatenate %152, %130 in 1 : vector<8x32xf32>, vector<8x32xf32> -> vector<8x64xf32>
    %cst_34 = arith.constant dense<0.000000e+00> : vector<8x128xf32>
    %154 = tpu.matmul %153, %1, %cst_34 {dimension_numbers = #tpu.dot_dimension_numbers<[1], [0], [0], [1], [0, 0, 1, 1], [], []>} : vector<8x64xf32>, vector<64x128xf32>, vector<8x128xf32> -> vector<8x128xf32>
    %155 = vector.broadcast %3 : vector<1x128xf32> to vector<8x128xf32>
    %156 = arith.addf %154, %155 : vector<8x128xf32>
    %157 = arith.negf %156 : vector<8x128xf32>
    %158 = math.exp %157 : vector<8x128xf32>
    %cst_35 = arith.constant 1.000000e+00 : f32
    %159 = vector.broadcast %cst_35 : f32 to vector<8x128xf32>
    %160 = arith.addf %159, %158 : vector<8x128xf32>
    %161 = arith.divf %159, %160 : vector<8x128xf32>
    %162 = vector.extract_strided_slice %161 {offsets = [0, 0], sizes = [8, 32], strides = [1, 1]} : vector<8x128xf32> to vector<8x32xf32>
    %163 = vector.extract_strided_slice %161 {offsets = [0, 32], sizes = [8, 32], strides = [1, 1]} : vector<8x128xf32> to vector<8x32xf32>
    %164 = vector.extract_strided_slice %161 {offsets = [0, 96], sizes = [8, 32], strides = [1, 1]} : vector<8x128xf32> to vector<8x32xf32>
    %165 = vector.extract_strided_slice %156 {offsets = [0, 64], sizes = [8, 32], strides = [1, 1]} : vector<8x128xf32> to vector<8x32xf32>
    %166 = math.tanh %165 : vector<8x32xf32>
    %167 = arith.mulf %163, %128 : vector<8x32xf32>
    %168 = arith.mulf %162, %166 : vector<8x32xf32>
    %169 = arith.addf %167, %168 : vector<8x32xf32>
    %170 = math.tanh %169 : vector<8x32xf32>
    %171 = arith.mulf %164, %170 : vector<8x32xf32>
    %c4_i32 = arith.constant 4 : i32
    %172 = arith.index_cast %c4_i32 : i32 to index
    %c0_36 = arith.constant 0 : index
    %c0_37 = arith.constant 0 : index
    %173 = vector.load %arg1[%172, %c0_36, %c0_37] : memref<8x8x16xf32, #tpu.memory_space<vmem>>, vector<1x8x16xf32>
    %174 = vector.shape_cast %173 : vector<1x8x16xf32> to vector<8x16xf32>
    %175 = tpu.concatenate %174, %152 in 1 : vector<8x16xf32>, vector<8x32xf32> -> vector<8x48xf32>
    %cst_38 = arith.constant dense<0.000000e+00> : vector<8x128xf32>
    %176 = tpu.matmul %175, %0, %cst_38 {dimension_numbers = #tpu.dot_dimension_numbers<[1], [0], [0], [1], [0, 0, 1, 1], [], []>} : vector<8x48xf32>, vector<48x128xf32>, vector<8x128xf32> -> vector<8x128xf32>
    %177 = vector.broadcast %2 : vector<1x128xf32> to vector<8x128xf32>
    %178 = arith.addf %176, %177 : vector<8x128xf32>
    %179 = arith.negf %178 : vector<8x128xf32>
    %180 = math.exp %179 : vector<8x128xf32>
    %cst_39 = arith.constant 1.000000e+00 : f32
    %181 = vector.broadcast %cst_39 : f32 to vector<8x128xf32>
    %182 = arith.addf %181, %180 : vector<8x128xf32>
    %183 = arith.divf %181, %182 : vector<8x128xf32>
    %184 = vector.extract_strided_slice %183 {offsets = [0, 0], sizes = [8, 32], strides = [1, 1]} : vector<8x128xf32> to vector<8x32xf32>
    %185 = vector.extract_strided_slice %183 {offsets = [0, 32], sizes = [8, 32], strides = [1, 1]} : vector<8x128xf32> to vector<8x32xf32>
    %186 = vector.extract_strided_slice %183 {offsets = [0, 96], sizes = [8, 32], strides = [1, 1]} : vector<8x128xf32> to vector<8x32xf32>
    %187 = vector.extract_strided_slice %178 {offsets = [0, 64], sizes = [8, 32], strides = [1, 1]} : vector<8x128xf32> to vector<8x32xf32>
    %188 = math.tanh %187 : vector<8x32xf32>
    %189 = arith.mulf %185, %150 : vector<8x32xf32>
    %190 = arith.mulf %184, %188 : vector<8x32xf32>
    %191 = arith.addf %189, %190 : vector<8x32xf32>
    %192 = math.tanh %191 : vector<8x32xf32>
    %193 = arith.mulf %186, %192 : vector<8x32xf32>
    %194 = tpu.concatenate %193, %171 in 1 : vector<8x32xf32>, vector<8x32xf32> -> vector<8x64xf32>
    %cst_40 = arith.constant dense<0.000000e+00> : vector<8x128xf32>
    %195 = tpu.matmul %194, %1, %cst_40 {dimension_numbers = #tpu.dot_dimension_numbers<[1], [0], [0], [1], [0, 0, 1, 1], [], []>} : vector<8x64xf32>, vector<64x128xf32>, vector<8x128xf32> -> vector<8x128xf32>
    %196 = vector.broadcast %3 : vector<1x128xf32> to vector<8x128xf32>
    %197 = arith.addf %195, %196 : vector<8x128xf32>
    %198 = arith.negf %197 : vector<8x128xf32>
    %199 = math.exp %198 : vector<8x128xf32>
    %cst_41 = arith.constant 1.000000e+00 : f32
    %200 = vector.broadcast %cst_41 : f32 to vector<8x128xf32>
    %201 = arith.addf %200, %199 : vector<8x128xf32>
    %202 = arith.divf %200, %201 : vector<8x128xf32>
    %203 = vector.extract_strided_slice %202 {offsets = [0, 0], sizes = [8, 32], strides = [1, 1]} : vector<8x128xf32> to vector<8x32xf32>
    %204 = vector.extract_strided_slice %202 {offsets = [0, 32], sizes = [8, 32], strides = [1, 1]} : vector<8x128xf32> to vector<8x32xf32>
    %205 = vector.extract_strided_slice %202 {offsets = [0, 96], sizes = [8, 32], strides = [1, 1]} : vector<8x128xf32> to vector<8x32xf32>
    %206 = vector.extract_strided_slice %197 {offsets = [0, 64], sizes = [8, 32], strides = [1, 1]} : vector<8x128xf32> to vector<8x32xf32>
    %207 = math.tanh %206 : vector<8x32xf32>
    %208 = arith.mulf %204, %169 : vector<8x32xf32>
    %209 = arith.mulf %203, %207 : vector<8x32xf32>
    %210 = arith.addf %208, %209 : vector<8x32xf32>
    %211 = math.tanh %210 : vector<8x32xf32>
    %212 = arith.mulf %205, %211 : vector<8x32xf32>
    %c5_i32 = arith.constant 5 : i32
    %213 = arith.index_cast %c5_i32 : i32 to index
    %c0_42 = arith.constant 0 : index
    %c0_43 = arith.constant 0 : index
    %214 = vector.load %arg1[%213, %c0_42, %c0_43] : memref<8x8x16xf32, #tpu.memory_space<vmem>>, vector<1x8x16xf32>
    %215 = vector.shape_cast %214 : vector<1x8x16xf32> to vector<8x16xf32>
    %216 = tpu.concatenate %215, %193 in 1 : vector<8x16xf32>, vector<8x32xf32> -> vector<8x48xf32>
    %cst_44 = arith.constant dense<0.000000e+00> : vector<8x128xf32>
    %217 = tpu.matmul %216, %0, %cst_44 {dimension_numbers = #tpu.dot_dimension_numbers<[1], [0], [0], [1], [0, 0, 1, 1], [], []>} : vector<8x48xf32>, vector<48x128xf32>, vector<8x128xf32> -> vector<8x128xf32>
    %218 = vector.broadcast %2 : vector<1x128xf32> to vector<8x128xf32>
    %219 = arith.addf %217, %218 : vector<8x128xf32>
    %220 = arith.negf %219 : vector<8x128xf32>
    %221 = math.exp %220 : vector<8x128xf32>
    %cst_45 = arith.constant 1.000000e+00 : f32
    %222 = vector.broadcast %cst_45 : f32 to vector<8x128xf32>
    %223 = arith.addf %222, %221 : vector<8x128xf32>
    %224 = arith.divf %222, %223 : vector<8x128xf32>
    %225 = vector.extract_strided_slice %224 {offsets = [0, 0], sizes = [8, 32], strides = [1, 1]} : vector<8x128xf32> to vector<8x32xf32>
    %226 = vector.extract_strided_slice %224 {offsets = [0, 32], sizes = [8, 32], strides = [1, 1]} : vector<8x128xf32> to vector<8x32xf32>
    %227 = vector.extract_strided_slice %224 {offsets = [0, 96], sizes = [8, 32], strides = [1, 1]} : vector<8x128xf32> to vector<8x32xf32>
    %228 = vector.extract_strided_slice %219 {offsets = [0, 64], sizes = [8, 32], strides = [1, 1]} : vector<8x128xf32> to vector<8x32xf32>
    %229 = math.tanh %228 : vector<8x32xf32>
    %230 = arith.mulf %226, %191 : vector<8x32xf32>
    %231 = arith.mulf %225, %229 : vector<8x32xf32>
    %232 = arith.addf %230, %231 : vector<8x32xf32>
    %233 = math.tanh %232 : vector<8x32xf32>
    %234 = arith.mulf %227, %233 : vector<8x32xf32>
    %235 = tpu.concatenate %234, %212 in 1 : vector<8x32xf32>, vector<8x32xf32> -> vector<8x64xf32>
    %cst_46 = arith.constant dense<0.000000e+00> : vector<8x128xf32>
    %236 = tpu.matmul %235, %1, %cst_46 {dimension_numbers = #tpu.dot_dimension_numbers<[1], [0], [0], [1], [0, 0, 1, 1], [], []>} : vector<8x64xf32>, vector<64x128xf32>, vector<8x128xf32> -> vector<8x128xf32>
    %237 = vector.broadcast %3 : vector<1x128xf32> to vector<8x128xf32>
    %238 = arith.addf %236, %237 : vector<8x128xf32>
    %239 = arith.negf %238 : vector<8x128xf32>
    %240 = math.exp %239 : vector<8x128xf32>
    %cst_47 = arith.constant 1.000000e+00 : f32
    %241 = vector.broadcast %cst_47 : f32 to vector<8x128xf32>
    %242 = arith.addf %241, %240 : vector<8x128xf32>
    %243 = arith.divf %241, %242 : vector<8x128xf32>
    %244 = vector.extract_strided_slice %243 {offsets = [0, 0], sizes = [8, 32], strides = [1, 1]} : vector<8x128xf32> to vector<8x32xf32>
    %245 = vector.extract_strided_slice %243 {offsets = [0, 32], sizes = [8, 32], strides = [1, 1]} : vector<8x128xf32> to vector<8x32xf32>
    %246 = vector.extract_strided_slice %243 {offsets = [0, 96], sizes = [8, 32], strides = [1, 1]} : vector<8x128xf32> to vector<8x32xf32>
    %247 = vector.extract_strided_slice %238 {offsets = [0, 64], sizes = [8, 32], strides = [1, 1]} : vector<8x128xf32> to vector<8x32xf32>
    %248 = math.tanh %247 : vector<8x32xf32>
    %249 = arith.mulf %245, %210 : vector<8x32xf32>
    %250 = arith.mulf %244, %248 : vector<8x32xf32>
    %251 = arith.addf %249, %250 : vector<8x32xf32>
    %252 = math.tanh %251 : vector<8x32xf32>
    %253 = arith.mulf %246, %252 : vector<8x32xf32>
    %c6_i32 = arith.constant 6 : i32
    %254 = arith.index_cast %c6_i32 : i32 to index
    %c0_48 = arith.constant 0 : index
    %c0_49 = arith.constant 0 : index
    %255 = vector.load %arg1[%254, %c0_48, %c0_49] : memref<8x8x16xf32, #tpu.memory_space<vmem>>, vector<1x8x16xf32>
    %256 = vector.shape_cast %255 : vector<1x8x16xf32> to vector<8x16xf32>
    %257 = tpu.concatenate %256, %234 in 1 : vector<8x16xf32>, vector<8x32xf32> -> vector<8x48xf32>
    %cst_50 = arith.constant dense<0.000000e+00> : vector<8x128xf32>
    %258 = tpu.matmul %257, %0, %cst_50 {dimension_numbers = #tpu.dot_dimension_numbers<[1], [0], [0], [1], [0, 0, 1, 1], [], []>} : vector<8x48xf32>, vector<48x128xf32>, vector<8x128xf32> -> vector<8x128xf32>
    %259 = vector.broadcast %2 : vector<1x128xf32> to vector<8x128xf32>
    %260 = arith.addf %258, %259 : vector<8x128xf32>
    %261 = arith.negf %260 : vector<8x128xf32>
    %262 = math.exp %261 : vector<8x128xf32>
    %cst_51 = arith.constant 1.000000e+00 : f32
    %263 = vector.broadcast %cst_51 : f32 to vector<8x128xf32>
    %264 = arith.addf %263, %262 : vector<8x128xf32>
    %265 = arith.divf %263, %264 : vector<8x128xf32>
    %266 = vector.extract_strided_slice %265 {offsets = [0, 0], sizes = [8, 32], strides = [1, 1]} : vector<8x128xf32> to vector<8x32xf32>
    %267 = vector.extract_strided_slice %265 {offsets = [0, 32], sizes = [8, 32], strides = [1, 1]} : vector<8x128xf32> to vector<8x32xf32>
    %268 = vector.extract_strided_slice %265 {offsets = [0, 96], sizes = [8, 32], strides = [1, 1]} : vector<8x128xf32> to vector<8x32xf32>
    %269 = vector.extract_strided_slice %260 {offsets = [0, 64], sizes = [8, 32], strides = [1, 1]} : vector<8x128xf32> to vector<8x32xf32>
    %270 = math.tanh %269 : vector<8x32xf32>
    %271 = arith.mulf %267, %232 : vector<8x32xf32>
    %272 = arith.mulf %266, %270 : vector<8x32xf32>
    %273 = arith.addf %271, %272 : vector<8x32xf32>
    %274 = math.tanh %273 : vector<8x32xf32>
    %275 = arith.mulf %268, %274 : vector<8x32xf32>
    %276 = tpu.concatenate %275, %253 in 1 : vector<8x32xf32>, vector<8x32xf32> -> vector<8x64xf32>
    %cst_52 = arith.constant dense<0.000000e+00> : vector<8x128xf32>
    %277 = tpu.matmul %276, %1, %cst_52 {dimension_numbers = #tpu.dot_dimension_numbers<[1], [0], [0], [1], [0, 0, 1, 1], [], []>} : vector<8x64xf32>, vector<64x128xf32>, vector<8x128xf32> -> vector<8x128xf32>
    %278 = vector.broadcast %3 : vector<1x128xf32> to vector<8x128xf32>
    %279 = arith.addf %277, %278 : vector<8x128xf32>
    %280 = arith.negf %279 : vector<8x128xf32>
    %281 = math.exp %280 : vector<8x128xf32>
    %cst_53 = arith.constant 1.000000e+00 : f32
    %282 = vector.broadcast %cst_53 : f32 to vector<8x128xf32>
    %283 = arith.addf %282, %281 : vector<8x128xf32>
    %284 = arith.divf %282, %283 : vector<8x128xf32>
    %285 = vector.extract_strided_slice %284 {offsets = [0, 0], sizes = [8, 32], strides = [1, 1]} : vector<8x128xf32> to vector<8x32xf32>
    %286 = vector.extract_strided_slice %284 {offsets = [0, 32], sizes = [8, 32], strides = [1, 1]} : vector<8x128xf32> to vector<8x32xf32>
    %287 = vector.extract_strided_slice %284 {offsets = [0, 96], sizes = [8, 32], strides = [1, 1]} : vector<8x128xf32> to vector<8x32xf32>
    %288 = vector.extract_strided_slice %279 {offsets = [0, 64], sizes = [8, 32], strides = [1, 1]} : vector<8x128xf32> to vector<8x32xf32>
    %289 = math.tanh %288 : vector<8x32xf32>
    %290 = arith.mulf %286, %251 : vector<8x32xf32>
    %291 = arith.mulf %285, %289 : vector<8x32xf32>
    %292 = arith.addf %290, %291 : vector<8x32xf32>
    %293 = math.tanh %292 : vector<8x32xf32>
    %294 = arith.mulf %287, %293 : vector<8x32xf32>
    %c7_i32 = arith.constant 7 : i32
    %295 = arith.index_cast %c7_i32 : i32 to index
    %c0_54 = arith.constant 0 : index
    %c0_55 = arith.constant 0 : index
    %296 = vector.load %arg1[%295, %c0_54, %c0_55] : memref<8x8x16xf32, #tpu.memory_space<vmem>>, vector<1x8x16xf32>
    %297 = vector.shape_cast %296 : vector<1x8x16xf32> to vector<8x16xf32>
    %298 = tpu.concatenate %297, %275 in 1 : vector<8x16xf32>, vector<8x32xf32> -> vector<8x48xf32>
    %cst_56 = arith.constant dense<0.000000e+00> : vector<8x128xf32>
    %299 = tpu.matmul %298, %0, %cst_56 {dimension_numbers = #tpu.dot_dimension_numbers<[1], [0], [0], [1], [0, 0, 1, 1], [], []>} : vector<8x48xf32>, vector<48x128xf32>, vector<8x128xf32> -> vector<8x128xf32>
    %300 = vector.broadcast %2 : vector<1x128xf32> to vector<8x128xf32>
    %301 = arith.addf %299, %300 : vector<8x128xf32>
    %302 = arith.negf %301 : vector<8x128xf32>
    %303 = math.exp %302 : vector<8x128xf32>
    %cst_57 = arith.constant 1.000000e+00 : f32
    %304 = vector.broadcast %cst_57 : f32 to vector<8x128xf32>
    %305 = arith.addf %304, %303 : vector<8x128xf32>
    %306 = arith.divf %304, %305 : vector<8x128xf32>
    %307 = vector.extract_strided_slice %306 {offsets = [0, 0], sizes = [8, 32], strides = [1, 1]} : vector<8x128xf32> to vector<8x32xf32>
    %308 = vector.extract_strided_slice %306 {offsets = [0, 32], sizes = [8, 32], strides = [1, 1]} : vector<8x128xf32> to vector<8x32xf32>
    %309 = vector.extract_strided_slice %306 {offsets = [0, 96], sizes = [8, 32], strides = [1, 1]} : vector<8x128xf32> to vector<8x32xf32>
    %310 = vector.extract_strided_slice %301 {offsets = [0, 64], sizes = [8, 32], strides = [1, 1]} : vector<8x128xf32> to vector<8x32xf32>
    %311 = math.tanh %310 : vector<8x32xf32>
    %312 = arith.mulf %308, %273 : vector<8x32xf32>
    %313 = arith.mulf %307, %311 : vector<8x32xf32>
    %314 = arith.addf %312, %313 : vector<8x32xf32>
    %315 = math.tanh %314 : vector<8x32xf32>
    %316 = arith.mulf %309, %315 : vector<8x32xf32>
    %317 = tpu.concatenate %316, %294 in 1 : vector<8x32xf32>, vector<8x32xf32> -> vector<8x64xf32>
    %cst_58 = arith.constant dense<0.000000e+00> : vector<8x128xf32>
    %318 = tpu.matmul %317, %1, %cst_58 {dimension_numbers = #tpu.dot_dimension_numbers<[1], [0], [0], [1], [0, 0, 1, 1], [], []>} : vector<8x64xf32>, vector<64x128xf32>, vector<8x128xf32> -> vector<8x128xf32>
    %319 = vector.broadcast %3 : vector<1x128xf32> to vector<8x128xf32>
    %320 = arith.addf %318, %319 : vector<8x128xf32>
    %321 = arith.negf %320 : vector<8x128xf32>
    %322 = math.exp %321 : vector<8x128xf32>
    %cst_59 = arith.constant 1.000000e+00 : f32
    %323 = vector.broadcast %cst_59 : f32 to vector<8x128xf32>
    %324 = arith.addf %323, %322 : vector<8x128xf32>
    %325 = arith.divf %323, %324 : vector<8x128xf32>
    %326 = vector.extract_strided_slice %325 {offsets = [0, 0], sizes = [8, 32], strides = [1, 1]} : vector<8x128xf32> to vector<8x32xf32>
    %327 = vector.extract_strided_slice %325 {offsets = [0, 32], sizes = [8, 32], strides = [1, 1]} : vector<8x128xf32> to vector<8x32xf32>
    %328 = vector.extract_strided_slice %325 {offsets = [0, 96], sizes = [8, 32], strides = [1, 1]} : vector<8x128xf32> to vector<8x32xf32>
    %329 = vector.extract_strided_slice %320 {offsets = [0, 64], sizes = [8, 32], strides = [1, 1]} : vector<8x128xf32> to vector<8x32xf32>
    %330 = math.tanh %329 : vector<8x32xf32>
    %331 = arith.mulf %327, %292 : vector<8x32xf32>
    %332 = arith.mulf %326, %330 : vector<8x32xf32>
    %333 = arith.addf %331, %332 : vector<8x32xf32>
    %334 = math.tanh %333 : vector<8x32xf32>
    %335 = arith.mulf %328, %334 : vector<8x32xf32>
    %c8_i32 = arith.constant 8 : i32
    %cst_60 = arith.constant 0.000000e+00 : f32
    %336 = vector.broadcast %cst_60 : f32 to vector<8x32xf32>
    %337 = arith.maximumf %335, %336 : vector<8x32xf32>
    %c0_61 = arith.constant 0 : index
    %c0_62 = arith.constant 0 : index
    %338 = vector.load %arg9[%c0_61, %c0_62] : memref<8x32xf32, #tpu.memory_space<vmem>>, vector<8x32xf32>
    tpu.vector_store %arg9[%c0_61, %c0_62], %337 {strides = array<i32>} : memref<8x32xf32, #tpu.memory_space<vmem>>, vector<8x32xf32>,
    %cst_63 = arith.constant dense<0.000000e+00> : vector<8x5xf32>
    %339 = tpu.matmul %337, %4, %cst_63 {dimension_numbers = #tpu.dot_dimension_numbers<[1], [0], [0], [1], [0, 0, 1, 1], [], []>} : vector<8x32xf32>, vector<32x5xf32>, vector<8x5xf32> -> vector<8x5xf32>
    %340 = vector.broadcast %5 : vector<1x5xf32> to vector<8x5xf32>
    %341 = arith.addf %339, %340 : vector<8x5xf32>
    %c0_64 = arith.constant 0 : index
    %c0_65 = arith.constant 0 : index
    %342 = vector.load %arg8[%c0_64, %c0_65] : memref<8x5xf32, #tpu.memory_space<vmem>>, vector<8x5xf32>
    tpu.vector_store %arg8[%c0_64, %c0_65], %341 {strides = array<i32>} : memref<8x5xf32, #tpu.memory_space<vmem>>, vector<8x5xf32>,
    return
  }
  func.func @transform_0(%arg0: i32) -> (i32, i32, i32) {
    %c0_i32 = arith.constant 0 : i32
    %c0_i32_0 = arith.constant 0 : i32
    %c0_i32_1 = arith.constant 0 : i32
    %c0_i32_2 = arith.constant 0 : i32
    return %c0_i32, %c0_i32_0, %c0_i32_1 : i32, i32, i32
  }
  func.func @transform_1(%arg0: i32) -> (i32, i32) {
    %c0_i32 = arith.constant 0 : i32
    %c0_i32_0 = arith.constant 0 : i32
    %c0_i32_1 = arith.constant 0 : i32
    return %c0_i32, %c0_i32_0 : i32, i32
  }
  func.func @transform_2(%arg0: i32) -> (i32, i32) {
    %c0_i32 = arith.constant 0 : i32
    %c0_i32_0 = arith.constant 0 : i32
    %c0_i32_1 = arith.constant 0 : i32
    return %c0_i32, %c0_i32_0 : i32, i32
  }
  func.func @transform_3(%arg0: i32) -> (i32, i32) {
    %c0_i32 = arith.constant 0 : i32
    %c0_i32_0 = arith.constant 0 : i32
    %c0_i32_1 = arith.constant 0 : i32
    return %c0_i32, %c0_i32_0 : i32, i32
  }
  func.func @transform_4(%arg0: i32) -> (i32, i32) {
    %c0_i32 = arith.constant 0 : i32
    %c0_i32_0 = arith.constant 0 : i32
    %c0_i32_1 = arith.constant 0 : i32
    return %c0_i32, %c0_i32_0 : i32, i32
  }
  func.func @transform_5(%arg0: i32) -> (i32, i32) {
    %c0_i32 = arith.constant 0 : i32
    %c0_i32_0 = arith.constant 0 : i32
    %c0_i32_1 = arith.constant 0 : i32
    return %c0_i32, %c0_i32_0 : i32, i32
  }
  func.func @transform_6(%arg0: i32) -> (i32, i32) {
    %c0_i32 = arith.constant 0 : i32
    %c0_i32_0 = arith.constant 0 : i32
    %c0_i32_1 = arith.constant 0 : i32
    return %c0_i32, %c0_i32_0 : i32, i32
  }
  func.func @transform_7(%arg0: i32) -> (i32, i32) {
    %c0_i32 = arith.constant 0 : i32
    %c0_i32_0 = arith.constant 0 : i32
    %c0_i32_1 = arith.constant 0 : i32
    return %c0_i32, %c0_i32_0 : i32, i32
  }
  func.func @transform_8(%arg0: i32) -> (i32, i32) {
    %c0_i32 = arith.constant 0 : i32
    %c0_i32_0 = arith.constant 0 : i32
    %c0_i32_1 = arith.constant 0 : i32
    return %c0_i32, %c0_i32_0 : i32, i32
  }
}

</mosaic_0001>

<bundles_post_ra>
// kernel: model_forward.1
= control target key start
LH: loop header
LB: loop body
LE: loop exit
PB: predicated region body
PF: predicated region fallthrough
CT: control target
= control target key end

     0   :  { %v2591_v0 = vmov 0.0|0.0   ;;  %vm2592_vm0 = vmmov 0   ;;  %v2593_v4 = vmov 0.0   ;;  %vm50_vm1 = vcmask 130048   ;;  %s2594_s20 = smov 64   ;;  %s2595_s21 = smov 32   ;;  %s3076_s1 = inlined_call_operand.vmem [shape: f32[48,128], index: 1, kind: input, shape index: {}]   ;;  %s3077_s0 = inlined_call_operand.vmem [shape: f32[8,8,16], index: 0, kind: input, shape index: {}]   ;;  %s3078_s2 = inlined_call_operand.vmem [shape: f32[1,128], index: 2, kind: input, shape index: {}]   ;;  %s3079_s3 = inlined_call_operand.vmem [shape: f32[64,128], index: 3, kind: input, shape index: {}]   ;;  %s3080_s4 = inlined_call_operand.vmem [shape: f32[1,128], index: 4, kind: input, shape index: {}]   ;;  %s3081_s5 = inlined_call_operand.vmem [shape: f32[32,5], index: 5, kind: input, shape index: {}]   ;;  %s3082_s8 = inlined_call_operand.vmem [shape: f32[8,32], index: 8, kind: output, shape index: {1}]   ;;  %s3083_s6 = inlined_call_operand.vmem [shape: f32[1,5], index: 6, kind: input, shape index: {}]   ;;  %s3084_s7 = inlined_call_operand.vmem [shape: f32[8,5], index: 7, kind: output, shape index: {0}]  }
   0x1   :  { %2282 = vmatprep.subr.bf16.mxu0 %v2591_v0  ;;  %v28_v1 = vld [vmem:[%s3076_s1] sm:$0xff]  ;;  %v29_v2 = vld [vmem:[%s3076_s1 + $0x8] sm:$0xff]  ;;  %v30_v3 = vld [vmem:[%s3076_s1 + $0x10] sm:$0xff]  ;;  %2011 = vmatprep.mubr.msk.f32.mxu0 %vm2592_vm0, %v2593_v4  ;;  %vm58_vm2 = vcmask 392192   ;;  %s2596_s16 = smov 48   ;;  %vm160_vm3 = vcmask 261120  }
   0x2   :  { %v2654_v5 = vpack.c.bf16 %v29_v2, %v28_v1  ;;  %v31_v6 = vld [vmem:[%s3076_s1 + $0x18] sm:$0xff]  ;;  %2291 = vmatprep.subr.bf16.mxu1 %v2591_v0  ;;  %2030 = vmatprep.mubr.msk.f32.mxu1 %vm2592_vm0, %v2593_v4  ;;  %v32_v8 = vld [vmem:[%s3076_s1 + $0x20] sm:$0xff]  ;;  %v33_v9 = vld [vmem:[%s3076_s1 + $0x28] sm:$0xff]  ;;  %vm168_vm4 = vcmask 523264   ;;  %vm1813_vm5 = vcmask 39936  }
   0x3   :  { %v2663_v7 = vpack.c.bf16 %v31_v6, %v30_v3  ;;  %v2673_v10 = vpack.c.bf16 %v33_v9, %v32_v8  ;;  %v49_v11 = vld [vmem:[%s3077_s0] sm:$0xff]  ;;  %v35_v28 = vld [vmem:[%s3079_s3 + $0x8] sm:$0xff]  ;;  %v36_v29 = vld [vmem:[%s3079_s3 + $0x10] sm:$0xff] }
   0x4   :  { %2284 = vmatpush3.bf16.msra.mxu0 %v2654_v5  ;;  %v51_v12 = vsel %vm50_vm1, %v49_v11, 0.0  ;;  %v2694_v13 = vld [vmem:[%s3078_s2] ss:$0 sm:$0xff]  ;;  %v37_v31 = vld [vmem:[%s3079_s3 + $0x18] sm:$0xff]  ;;  %v39_v34 = vld [vmem:[%s3079_s3 + $0x28] sm:$0xff] }
   0x5   :  { %2285 = vmatprep.subr.bf16.mxu0 %v2591_v0  ;;  %v34_v27 = vld [vmem:[%s3079_s3] sm:$0xff]  ;;  %v2717_v32 = vpack.c.bf16 %v37_v31, %v36_v29  ;;  %v40_v36 = vld [vmem:[%s3079_s3 + $0x30] sm:$0xff]  ;;  %v41_v37 = vld [vmem:[%s3079_s3 + $0x38] sm:$0xff] }
   0x6   :  { %v2711_v30 = vpack.c.bf16 %v35_v28, %v34_v27  ;;  %v38_v33 = vld [vmem:[%s3079_s3 + $0x20] sm:$0xff]  ;;  %v2738_v39 = vpack.c.bf16 %v41_v37, %v40_v36  ;;  %v1829_v42 = vld [vmem:[%s3077_s0 + $0x8] sm:$0xff] }
   0x7   :  { %v2727_v35 = vpack.c.bf16 %v39_v34, %v38_v33  ;;  %v2773_v47 = vld [vmem:[%s3080_s4] ss:$0 sm:$0xff] }
   0x8   :  { %2287 = vmatpush3.bf16.msra.mxu0 %v2663_v7  ;;  %2293 = vmatpush3.bf16.msra.mxu1 %v2711_v30 }
   0x9   :  { %2288 = vmatprep.subr.bf16.mxu0 %v2591_v0  ;;  %2294 = vmatprep.subr.bf16.mxu1 %v2591_v0 }
   0xc   :  { %2290 = vmatpush3.bf16.msra.mxu0 %v2673_v10  ;;  %2296 = vmatpush3.bf16.msra.mxu1 %v2717_v32 }
   0xd   :  { %2303 = vmatprep.subr.bf16.mxu0 %v2591_v0  ;;  %2297 = vmatprep.subr.bf16.mxu1 %v2591_v0 }
   0xf   :  { %2012 = vmatmul.mubr.msk.f32.vlgmr.msra.gmra.mrb[0].mxu0 %vm58_vm2, %v51_v12 }
  0x10   :  { %2305 = vmatpush3.bf16.msra.mxu0 %v2654_v5  ;;  %2045 = vmatprep.mubr.msk.f32.mxu0 %vm2592_vm0, %v2593_v4 }
  0x11   :  { %2306 = vmatprep.subr.bf16.mxu0 %v2591_v0  ;;  %2299 = vmatpush3.bf16.msra.mxu1 %v2727_v35 }
  0x12   :  { %2300 = vmatprep.subr.bf16.mxu1 %v2591_v0 }
  0x14   :  { %2308 = vmatpush3.bf16.msra.mxu0 %v2663_v7 }
  0x15   :  { %2309 = vmatprep.subr.bf16.mxu0 %v2591_v0  ;;  %2302 = vmatpush3.bf16.msra.mxu1 %v2738_v39 }
  0x16   :  { %2312 = vmatprep.subr.bf16.mxu1 %v2591_v0 }
  0x18   :  { %2311 = vmatpush3.bf16.msra.mxu0 %v2673_v10 }
  0x19   :  { %2324 = vmatprep.subr.bf16.mxu0 %v2591_v0 }
  0xe2   :  { %v128_v14 = vpop.f32.mrb[0].mxu0 }
  0xe3   :  { %v129_v15 = vadd.f32 %v2694_v13, %v128_v14  ;;  %v2013_v16 = vpop.f32.mrb[1].mxu0 }
  0xe5   :  { %2462 = vtanh.f32 %v129_v15  ;;  %v1825_v18 = vmul.f32 -1.442695, %v129_v15 }
  0xe7   :  { %2464 = vpow2.f32 %v1825_v18 }
  0xef   :  { %v2463_v17 = vpop.eup %2462 }
  0xf0   :  { %141 = vrot.lane.b32.xlu0 %v2463_v17, %s2594_s20 }
  0xf1   :  { %v2465_v19 = vpop.eup %2464 }
  0xf2   :  { %v135_v20 = vadd.f32 1.0, %v2465_v19 }
  0xf4   :  { %2466 = vrcp.f32 %v135_v20 }
  0xfe   :  { %v2467_v21 = vpop.eup %2466 }
  0xff   :  { %v139_v24 = vmul.f32 0.0, %v2467_v21 }
 0x162   :  { %v142_v22 = vpop.permute.xlu0 %141 }
 0x163   :  { %v144_v23 = vmul.f32 %v2467_v21, %v142_v22 }
 0x165   :  { %146 = vrot.lane.b32.xlu0 %v144_v23, %s2595_s21 }
 0x1d7   :  { %v147_v25 = vpop.permute.xlu0 %146 }
 0x1d8   :  { %v2699_v26 = vadd.f32 %v147_v25, %v139_v24  ;;  %v1834_v25 = vld [vmem:[%s3077_s0 + $0x10] sm:$0xff] }
 0x1da   :  { %2468 = vtanh.f32 %v2699_v26 }
 0x1e4   :  { %v2469_v38 = vpop.eup %2468 }
 0x1e5   :  { %152 = vrot.lane.b32.xlu1 %v2469_v38, %s2594_s20 }
 0x257   :  { %v153_v40 = vpop.permute.xlu1 %152 }
 0x258   :  { %v155_v41 = vmul.f32 %v2467_v21, %v153_v40 }
 0x25a   :  { %268 = vrot.lane.b32.xlu0 %v155_v41, %s2596_s16  ;;  %157 = vrot.lane.b32.xlu1 %v155_v41, %s2595_s21 }
 0x2cc   :  { %v269_v43 = vpop.permute.xlu0 %268  ;;  %v158_v44 = vpop.permute.xlu1 %157 }
 0x2cd   :  { %v271_v45 = vsel %vm50_vm1, %v1829_v42, %v269_v43  ;;  %v161_v46 = vsel %vm160_vm3, %v158_v44, 0.0 }
 0x2ce   :  { %2031 = vmatmul.mubr.msk.f32.vlgmr.msra.gmra.mrb[0].mxu1 %vm168_vm4, %v161_v46  ;;  %2046 = vmatmul.mubr.msk.f32.vlgmr.msra.gmra.mrb[2].mxu0 %vm58_vm2, %v271_v45 }
 0x2cf   :  { %2314 = vmatpush3.bf16.msra.mxu1 %v2711_v30  ;;  %2326 = vmatpush3.bf16.msra.mxu0 %v2654_v5 }
 0x2d0   :  { %2315 = vmatprep.subr.bf16.mxu1 %v2591_v0  ;;  %2327 = vmatprep.subr.bf16.mxu0 %v2591_v0 }
 0x2d1   :  { %2064 = vmatprep.mubr.msk.f32.mxu1 %vm2592_vm0, %v2593_v4  ;;  %2079 = vmatprep.mubr.msk.f32.mxu0 %vm2592_vm0, %v2593_v4 }
 0x2d3   :  { %2317 = vmatpush3.bf16.msra.mxu1 %v2717_v32  ;;  %2329 = vmatpush3.bf16.msra.mxu0 %v2663_v7 }
 0x2d4   :  { %2318 = vmatprep.subr.bf16.mxu1 %v2591_v0  ;;  %2330 = vmatprep.subr.bf16.mxu0 %v2591_v0 }
 0x2d7   :  { %2320 = vmatpush3.bf16.msra.mxu1 %v2727_v35  ;;  %2332 = vmatpush3.bf16.msra.mxu0 %v2673_v10 }
 0x2d8   :  { %2321 = vmatprep.subr.bf16.mxu1 %v2591_v0  ;;  %2345 = vmatprep.subr.bf16.mxu0 %v2591_v0 }
 0x2db   :  { %2323 = vmatpush3.bf16.msra.mxu1 %v2738_v39 }
 0x2dc   :  { %2333 = vmatprep.subr.bf16.mxu1 %v2591_v0 }
 0x3a1   :  { %v238_v48 = vpop.f32.mrb[0].mxu1  ;;  %v341_v49 = vpop.f32.mrb[2].mxu0 }
 0x3a2   :  { %v239_v50 = vadd.f32 %v2773_v47, %v238_v48  ;;  %v342_v51 = vadd.f32 %v2694_v13, %v341_v49  ;;  %v2032_v52 = vpop.f32.mrb[1].mxu1  ;;  %v2047_v53 = vpop.f32.mrb[3].mxu0 }
 0x3a4   :  { %2470 = vtanh.f32 %v239_v50  ;;  %v1828_v56 = vmul.f32 -1.442695, %v239_v50  ;;  %v1831_v57 = vmul.f32 -1.442695, %v342_v51 }
 0x3a5   :  { %2472 = vtanh.f32 %v342_v51 }
 0x3a6   :  { %2474 = vpow2.f32 %v1828_v56 }
 0x3a7   :  { %2476 = vpow2.f32 %v1831_v57 }
 0x3ae   :  { %v2471_v54 = vpop.eup %2470 }
 0x3af   :  { %v2473_v55 = vpop.eup %2472  ;;  %251 = vrot.lane.b32.xlu1 %v2471_v54, %s2594_s20 }
 0x3b0   :  { %354 = vrot.lane.b32.xlu0 %v2473_v55, %s2594_s20  ;;  %v2475_v58 = vpop.eup %2474 }
 0x3b1   :  { %v2477_v59 = vpop.eup %2476  ;;  %v245_v60 = vadd.f32 1.0, %v2475_v58 }
 0x3b2   :  { %v348_v61 = vadd.f32 1.0, %v2477_v59 }
 0x3b3   :  { %2478 = vrcp.f32 %v245_v60 }
 0x3b4   :  { %2480 = vrcp.f32 %v348_v61 }
 0x3bd   :  { %v2479_v62 = vpop.eup %2478 }
 0x3be   :  { %v2481_v1 = vpop.eup %2480  ;;  %v249_v8 = vmul.f32 0.0, %v2479_v62 }
 0x3bf   :  { %v352_v11 = vmul.f32 %v2481_v1, %v2699_v26 }
 0x421   :  { %v252_v63 = vpop.permute.xlu1 %251 }
 0x422   :  { %v254_v2 = vmul.f32 %v2479_v62, %v252_v63  ;;  %v355_v3 = vpop.permute.xlu0 %354 }
 0x423   :  { %v357_v6 = vmul.f32 %v2481_v1, %v355_v3 }
 0x424   :  { %256 = vrot.lane.b32.xlu1 %v254_v2, %s2595_s21 }
 0x425   :  { %359 = vrot.lane.b32.xlu0 %v357_v6, %s2595_s21 }
 0x496   :  { %v257_v9 = vpop.permute.xlu1 %256 }
 0x497   :  { %v2782_v12 = vadd.f32 %v257_v9, %v249_v8  ;;  %v360_v14 = vpop.permute.xlu0 %359  ;;  %v1839_v8 = vld [vmem:[%s3077_s0 + $0x18] sm:$0xff] }
 0x498   :  { %v2784_v15 = vadd.f32 %v360_v14, %v352_v11 }
 0x499   :  { %2482 = vtanh.f32 %v2782_v12 }
 0x49a   :  { %2484 = vtanh.f32 %v2784_v15 }
 0x4a3   :  { %v2483_v16 = vpop.eup %2482 }
 0x4a4   :  { %v2485_v17 = vpop.eup %2484  ;;  %262 = vrot.lane.b32.xlu1 %v2483_v16, %s2594_s20 }
 0x4a5   :  { %365 = vrot.lane.b32.xlu0 %v2485_v17, %s2594_s20 }
 0x516   :  { %v263_v18 = vpop.permute.xlu1 %262 }
 0x517   :  { %v265_v19 = vmul.f32 %v2479_v62, %v263_v18  ;;  %v366_v20 = vpop.permute.xlu0 %365 }
 0x518   :  { %v368_v21 = vmul.f32 %v2481_v1, %v366_v20 }
 0x519   :  { %374 = vrot.lane.b32.xlu0 %v265_v19, %s2594_s20 }
 0x51a   :  { %370 = vrot.lane.b32.xlu1 %v368_v21, %s2595_s21 }
 0x51e   :  { %477 = vrot.lane.b32.xlu1 %v368_v21, %s2596_s16 }
 0x58b   :  { %v375_v22 = vpop.permute.xlu0 %374 }
 0x58c   :  { %v371_v23 = vpop.permute.xlu1 %370 }
 0x58d   :  { %v377_v24 = vsel %vm160_vm3, %v371_v23, %v375_v22 }
 0x58e   :  { %2065 = vmatmul.mubr.msk.f32.vlgmr.msra.gmra.mrb[2].mxu1 %vm168_vm4, %v377_v24 }
 0x58f   :  { %2335 = vmatpush3.bf16.msra.mxu1 %v2711_v30  ;;  %2098 = vmatprep.mubr.msk.f32.mxu1 %vm2592_vm0, %v2593_v4 }
 0x590   :  { %v478_v26 = vpop.permute.xlu1 %477  ;;  %2336 = vmatprep.subr.bf16.mxu1 %v2591_v0 }
 0x591   :  { %v480_v27 = vsel %vm50_vm1, %v1834_v25, %v478_v26 }
 0x592   :  { %2080 = vmatmul.mubr.msk.f32.vlgmr.msra.gmra.mrb[4].mxu0 %vm58_vm2, %v480_v27 }
 0x593   :  { %2338 = vmatpush3.bf16.msra.mxu1 %v2717_v32  ;;  %2347 = vmatpush3.bf16.msra.mxu0 %v2654_v5 }
 0x594   :  { %2339 = vmatprep.subr.bf16.mxu1 %v2591_v0  ;;  %2348 = vmatprep.subr.bf16.mxu0 %v2591_v0 }
 0x595   :  { %2113 = vmatprep.mubr.msk.f32.mxu0 %vm2592_vm0, %v2593_v4 }
 0x597   :  { %2341 = vmatpush3.bf16.msra.mxu1 %v2727_v35  ;;  %2350 = vmatpush3.bf16.msra.mxu0 %v2663_v7 }
 0x598   :  { %2342 = vmatprep.subr.bf16.mxu1 %v2591_v0  ;;  %2351 = vmatprep.subr.bf16.mxu0 %v2591_v0 }
 0x59b   :  { %2344 = vmatpush3.bf16.msra.mxu1 %v2738_v39  ;;  %2353 = vmatpush3.bf16.msra.mxu0 %v2673_v10 }
 0x59c   :  { %2354 = vmatprep.subr.bf16.mxu0 %v2591_v0  ;;  %2366 = vmatprep.subr.bf16.mxu1 %v2591_v0 }
 0x661   :  { %v447_v28 = vpop.f32.mrb[2].mxu1 }
 0x662   :  { %v448_v29 = vadd.f32 %v2773_v47, %v447_v28  ;;  %v2066_v31 = vpop.f32.mrb[3].mxu1 }
 0x664   :  { %2486 = vtanh.f32 %v448_v29  ;;  %v1833_v40 = vmul.f32 -1.442695, %v448_v29 }
 0x665   :  { %v550_v33 = vpop.f32.mrb[4].mxu0 }
 0x666   :  { %v551_v34 = vadd.f32 %v2694_v13, %v550_v33  ;;  %v2081_v36 = vpop.f32.mrb[5].mxu0 }
 0x668   :  { %2488 = vtanh.f32 %v551_v34  ;;  %v1836_v41 = vmul.f32 -1.442695, %v551_v34 }
 0x669   :  { %2490 = vpow2.f32 %v1833_v40 }
 0x66a   :  { %2492 = vpow2.f32 %v1836_v41 }
 0x66e   :  { %v2487_v37 = vpop.eup %2486 }
 0x66f   :  { %460 = vrot.lane.b32.xlu0 %v2487_v37, %s2594_s20 }
 0x672   :  { %v2489_v38 = vpop.eup %2488 }
 0x673   :  { %563 = vrot.lane.b32.xlu1 %v2489_v38, %s2594_s20  ;;  %v2491_v42 = vpop.eup %2490 }
 0x674   :  { %v454_v43 = vadd.f32 1.0, %v2491_v42  ;;  %v2493_v44 = vpop.eup %2492 }
 0x675   :  { %v557_v45 = vadd.f32 1.0, %v2493_v44 }
 0x676   :  { %2494 = vrcp.f32 %v454_v43 }
 0x677   :  { %2496 = vrcp.f32 %v557_v45 }
 0x680   :  { %v2495_v46 = vpop.eup %2494 }
 0x681   :  { %v2497_v50 = vpop.eup %2496  ;;  %v458_v53 = vmul.f32 %v2495_v46, %v2782_v12 }
 0x682   :  { %v561_v56 = vmul.f32 %v2497_v50, %v2784_v15 }
 0x6e1   :  { %v461_v48 = vpop.permute.xlu0 %460 }
 0x6e2   :  { %v463_v49 = vmul.f32 %v2495_v46, %v461_v48 }
 0x6e4   :  { %465 = vrot.lane.b32.xlu0 %v463_v49, %s2595_s21 }
 0x6e5   :  { %v564_v51 = vpop.permute.xlu1 %563 }
 0x6e6   :  { %v566_v52 = vmul.f32 %v2497_v50, %v564_v51 }
 0x6e8   :  { %568 = vrot.lane.b32.xlu1 %v566_v52, %s2595_s21 }
 0x756   :  { %v466_v54 = vpop.permute.xlu0 %465 }
 0x757   :  { %v2825_v55 = vadd.f32 %v466_v54, %v458_v53  ;;  %v1844_v53 = vld [vmem:[%s3077_s0 + $0x20] sm:$0xff] }
 0x759   :  { %2498 = vtanh.f32 %v2825_v55 }
 0x75a   :  { %v569_v57 = vpop.permute.xlu1 %568 }
 0x75b   :  { %v2829_v58 = vadd.f32 %v569_v57, %v561_v56 }
 0x75d   :  { %2500 = vtanh.f32 %v2829_v58 }
 0x763   :  { %v2499_v59 = vpop.eup %2498 }
 0x764   :  { %471 = vrot.lane.b32.xlu0 %v2499_v59, %s2594_s20 }
 0x767   :  { %v2501_v60 = vpop.eup %2500 }
 0x768   :  { %574 = vrot.lane.b32.xlu1 %v2501_v60, %s2594_s20 }
 0x7d6   :  { %v472_v61 = vpop.permute.xlu0 %471 }
 0x7d7   :  { %v474_v62 = vmul.f32 %v2495_v46, %v472_v61 }
 0x7d9   :  { %583 = vrot.lane.b32.xlu1 %v474_v62, %s2594_s20 }
 0x7da   :  { %v575_v63 = vpop.permute.xlu1 %574 }
 0x7db   :  { %v577_v1 = vmul.f32 %v2497_v50, %v575_v63 }
 0x7dd   :  { %579 = vrot.lane.b32.xlu0 %v577_v1, %s2595_s21 }
 0x7e1   :  { %686 = vrot.lane.b32.xlu0 %v577_v1, %s2596_s16 }
 0x84b   :  { %v584_v2 = vpop.permute.xlu1 %583 }
 0x84f   :  { %v580_v3 = vpop.permute.xlu0 %579 }
 0x850   :  { %v586_v6 = vsel %vm160_vm3, %v580_v3, %v584_v2 }
 0x851   :  { %2099 = vmatmul.mubr.msk.f32.vlgmr.msra.gmra.mrb[4].mxu1 %vm168_vm4, %v586_v6 }
 0x852   :  { %2368 = vmatpush3.bf16.msra.mxu1 %v2654_v5  ;;  %2147 = vmatprep.mubr.msk.f32.mxu1 %vm2592_vm0, %v2593_v4 }
 0x853   :  { %v687_v9 = vpop.permute.xlu0 %686  ;;  %2369 = vmatprep.subr.bf16.mxu1 %v2591_v0 }
 0x854   :  { %v689_v11 = vsel %vm50_vm1, %v1839_v8, %v687_v9 }
 0x855   :  { %2114 = vmatmul.mubr.msk.f32.vlgmr.msra.gmra.mrb[6].mxu0 %vm58_vm2, %v689_v11 }
 0x856   :  { %2356 = vmatpush3.bf16.msra.mxu0 %v2711_v30  ;;  %2371 = vmatpush3.bf16.msra.mxu1 %v2663_v7 }
 0x857   :  { %2357 = vmatprep.subr.bf16.mxu0 %v2591_v0  ;;  %2132 = vmatprep.mubr.msk.f32.mxu0 %vm2592_vm0, %v2593_v4 }
 0x858   :  { %2372 = vmatprep.subr.bf16.mxu1 %v2591_v0 }
 0x85a   :  { %2359 = vmatpush3.bf16.msra.mxu0 %v2717_v32  ;;  %2374 = vmatpush3.bf16.msra.mxu1 %v2673_v10 }
 0x85b   :  { %2360 = vmatprep.subr.bf16.mxu0 %v2591_v0  ;;  %2375 = vmatprep.subr.bf16.mxu1 %v2591_v0 }
 0x85e   :  { %2362 = vmatpush3.bf16.msra.mxu0 %v2727_v35 }
 0x85f   :  { %2363 = vmatprep.subr.bf16.mxu0 %v2591_v0 }
 0x862   :  { %2365 = vmatpush3.bf16.msra.mxu0 %v2738_v39 }
 0x863   :  { %2387 = vmatprep.subr.bf16.mxu0 %v2591_v0 }
 0x924   :  { %v656_v12 = vpop.f32.mrb[4].mxu1 }
 0x925   :  { %v657_v14 = vadd.f32 %v2773_v47, %v656_v12  ;;  %v2100_v15 = vpop.f32.mrb[5].mxu1 }
 0x927   :  { %2502 = vtanh.f32 %v657_v14  ;;  %v1838_v21 = vmul.f32 -1.442695, %v657_v14 }
 0x928   :  { %v759_v16 = vpop.f32.mrb[6].mxu0 }
 0x929   :  { %v760_v17 = vadd.f32 %v2694_v13, %v759_v16  ;;  %v2115_v18 = vpop.f32.mrb[7].mxu0 }
 0x92b   :  { %2504 = vtanh.f32 %v760_v17  ;;  %v1841_v22 = vmul.f32 -1.442695, %v760_v17 }
 0x92c   :  { %2506 = vpow2.f32 %v1838_v21 }
 0x92d   :  { %2508 = vpow2.f32 %v1841_v22 }
 0x931   :  { %v2503_v19 = vpop.eup %2502 }
 0x932   :  { %669 = vrot.lane.b32.xlu1 %v2503_v19, %s2594_s20 }
 0x935   :  { %v2505_v20 = vpop.eup %2504 }
 0x936   :  { %772 = vrot.lane.b32.xlu0 %v2505_v20, %s2594_s20  ;;  %v2507_v23 = vpop.eup %2506 }
 0x937   :  { %v663_v24 = vadd.f32 1.0, %v2507_v23  ;;  %v2509_v25 = vpop.eup %2508 }
 0x938   :  { %v766_v26 = vadd.f32 1.0, %v2509_v25 }
 0x939   :  { %2510 = vrcp.f32 %v663_v24 }
 0x93a   :  { %2512 = vrcp.f32 %v766_v26 }
 0x943   :  { %v2511_v27 = vpop.eup %2510 }
 0x944   :  { %v2513_v31 = vpop.eup %2512  ;;  %v667_v36 = vmul.f32 %v2511_v27, %v2825_v55 }
 0x945   :  { %v770_v40 = vmul.f32 %v2513_v31, %v2829_v58 }
 0x9a4   :  { %v670_v28 = vpop.permute.xlu1 %669 }
 0x9a5   :  { %v672_v29 = vmul.f32 %v2511_v27, %v670_v28 }
 0x9a7   :  { %674 = vrot.lane.b32.xlu1 %v672_v29, %s2595_s21 }
 0x9a8   :  { %v773_v33 = vpop.permute.xlu0 %772 }
 0x9a9   :  { %v775_v34 = vmul.f32 %v2513_v31, %v773_v33 }
 0x9ab   :  { %777 = vrot.lane.b32.xlu0 %v775_v34, %s2595_s21 }
 0xa19   :  { %v675_v37 = vpop.permute.xlu1 %674 }
 0xa1a   :  { %v2869_v38 = vadd.f32 %v675_v37, %v667_v36  ;;  %v1849_v36 = vld [vmem:[%s3077_s0 + $0x28] sm:$0xff] }
 0xa1c   :  { %2514 = vtanh.f32 %v2869_v38 }
 0xa1d   :  { %v778_v41 = vpop.permute.xlu0 %777 }
 0xa1e   :  { %v2873_v42 = vadd.f32 %v778_v41, %v770_v40 }
 0xa20   :  { %2516 = vtanh.f32 %v2873_v42 }
 0xa26   :  { %v2515_v43 = vpop.eup %2514 }
 0xa27   :  { %680 = vrot.lane.b32.xlu1 %v2515_v43, %s2594_s20 }
 0xa2a   :  { %v2517_v44 = vpop.eup %2516 }
 0xa2b   :  { %783 = vrot.lane.b32.xlu0 %v2517_v44, %s2594_s20 }
 0xa99   :  { %v681_v45 = vpop.permute.xlu1 %680 }
 0xa9a   :  { %v683_v46 = vmul.f32 %v2511_v27, %v681_v45 }
 0xa9c   :  { %792 = vrot.lane.b32.xlu0 %v683_v46, %s2594_s20 }
 0xa9d   :  { %v784_v48 = vpop.permute.xlu0 %783 }
 0xa9e   :  { %v786_v49 = vmul.f32 %v2513_v31, %v784_v48 }
 0xaa0   :  { %788 = vrot.lane.b32.xlu1 %v786_v49, %s2595_s21 }
 0xaa4   :  { %895 = vrot.lane.b32.xlu1 %v786_v49, %s2596_s16 }
 0xb0e   :  { %v793_v50 = vpop.permute.xlu0 %792 }
 0xb12   :  { %v789_v51 = vpop.permute.xlu1 %788 }
 0xb13   :  { %v795_v52 = vsel %vm160_vm3, %v789_v51, %v793_v50 }
 0xb14   :  { %2133 = vmatmul.mubr.msk.f32.vlgmr.msra.gmra.mrb[8].mxu0 %vm168_vm4, %v795_v52 }
 0xb15   :  { %2389 = vmatpush3.bf16.msra.mxu0 %v2654_v5  ;;  %2181 = vmatprep.mubr.msk.f32.mxu0 %vm2592_vm0, %v2593_v4 }
 0xb16   :  { %v896_v54 = vpop.permute.xlu1 %895  ;;  %2390 = vmatprep.subr.bf16.mxu0 %v2591_v0 }
 0xb17   :  { %v898_v55 = vsel %vm50_vm1, %v1844_v53, %v896_v54 }
 0xb18   :  { %2148 = vmatmul.mubr.msk.f32.vlgmr.msra.gmra.mrb[6].mxu1 %vm58_vm2, %v898_v55 }
 0xb19   :  { %2377 = vmatpush3.bf16.msra.mxu1 %v2711_v30  ;;  %2392 = vmatpush3.bf16.msra.mxu0 %v2663_v7 }
 0xb1a   :  { %2378 = vmatprep.subr.bf16.mxu1 %v2591_v0  ;;  %2166 = vmatprep.mubr.msk.f32.mxu1 %vm2592_vm0, %v2593_v4 }
 0xb1b   :  { %2393 = vmatprep.subr.bf16.mxu0 %v2591_v0 }
 0xb1d   :  { %2380 = vmatpush3.bf16.msra.mxu1 %v2717_v32  ;;  %2395 = vmatpush3.bf16.msra.mxu0 %v2673_v10 }
 0xb1e   :  { %2381 = vmatprep.subr.bf16.mxu1 %v2591_v0  ;;  %2396 = vmatprep.subr.bf16.mxu0 %v2591_v0 }
 0xb21   :  { %2383 = vmatpush3.bf16.msra.mxu1 %v2727_v35 }
 0xb22   :  { %2384 = vmatprep.subr.bf16.mxu1 %v2591_v0 }
 0xb25   :  { %2386 = vmatpush3.bf16.msra.mxu1 %v2738_v39 }
 0xb26   :  { %2408 = vmatprep.subr.bf16.mxu1 %v2591_v0 }
 0xbe7   :  { %v865_v56 = vpop.f32.mrb[8].mxu0 }
 0xbe8   :  { %v866_v57 = vadd.f32 %v2773_v47, %v865_v56  ;;  %v2134_v58 = vpop.f32.mrb[9].mxu0 }
 0xbea   :  { %2518 = vtanh.f32 %v866_v57  ;;  %v1843_v1 = vmul.f32 -1.442695, %v866_v57 }
 0xbeb   :  { %v968_v59 = vpop.f32.mrb[6].mxu1 }
 0xbec   :  { %v969_v60 = vadd.f32 %v2694_v13, %v968_v59  ;;  %v2149_v61 = vpop.f32.mrb[7].mxu1 }
 0xbee   :  { %2520 = vtanh.f32 %v969_v60  ;;  %v1846_v2 = vmul.f32 -1.442695, %v969_v60 }
 0xbef   :  { %2522 = vpow2.f32 %v1843_v1 }
 0xbf0   :  { %2524 = vpow2.f32 %v1846_v2 }
 0xbf4   :  { %v2519_v62 = vpop.eup %2518 }
 0xbf5   :  { %878 = vrot.lane.b32.xlu0 %v2519_v62, %s2594_s20 }
 0xbf8   :  { %v2521_v63 = vpop.eup %2520 }
 0xbf9   :  { %981 = vrot.lane.b32.xlu1 %v2521_v63, %s2594_s20  ;;  %v2523_v3 = vpop.eup %2522 }
 0xbfa   :  { %v872_v6 = vadd.f32 1.0, %v2523_v3  ;;  %v2525_v8 = vpop.eup %2524 }
 0xbfb   :  { %v975_v9 = vadd.f32 1.0, %v2525_v8 }
 0xbfc   :  { %2526 = vrcp.f32 %v872_v6 }
 0xbfd   :  { %2528 = vrcp.f32 %v975_v9 }
 0xc06   :  { %v2527_v11 = vpop.eup %2526 }
 0xc07   :  { %v2529_v15 = vpop.eup %2528  ;;  %v876_v18 = vmul.f32 %v2527_v11, %v2869_v38 }
 0xc08   :  { %v979_v21 = vmul.f32 %v2529_v15, %v2873_v42 }
 0xc67   :  { %v879_v12 = vpop.permute.xlu0 %878 }
 0xc68   :  { %v881_v14 = vmul.f32 %v2527_v11, %v879_v12 }
 0xc6a   :  { %883 = vrot.lane.b32.xlu0 %v881_v14, %s2595_s21 }
 0xc6b   :  { %v982_v16 = vpop.permute.xlu1 %981 }
 0xc6c   :  { %v984_v17 = vmul.f32 %v2529_v15, %v982_v16 }
 0xc6e   :  { %986 = vrot.lane.b32.xlu1 %v984_v17, %s2595_s21 }
 0xcdc   :  { %v884_v19 = vpop.permute.xlu0 %883 }
 0xcdd   :  { %v2913_v20 = vadd.f32 %v884_v19, %v876_v18  ;;  %v1854_v18 = vld [vmem:[%s3077_s0 + $0x30] sm:$0xff] }
 0xcdf   :  { %2530 = vtanh.f32 %v2913_v20 }
 0xce0   :  { %v987_v22 = vpop.permute.xlu1 %986 }
 0xce1   :  { %v2917_v23 = vadd.f32 %v987_v22, %v979_v21 }
 0xce3   :  { %2532 = vtanh.f32 %v2917_v23 }
 0xce9   :  { %v2531_v24 = vpop.eup %2530 }
 0xcea   :  { %889 = vrot.lane.b32.xlu0 %v2531_v24, %s2594_s20 }
 0xced   :  { %v2533_v25 = vpop.eup %2532 }
 0xcee   :  { %992 = vrot.lane.b32.xlu1 %v2533_v25, %s2594_s20 }
 0xd5c   :  { %v890_v26 = vpop.permute.xlu0 %889 }
 0xd5d   :  { %v892_v27 = vmul.f32 %v2527_v11, %v890_v26 }
 0xd5f   :  { %1001 = vrot.lane.b32.xlu1 %v892_v27, %s2594_s20 }
 0xd60   :  { %v993_v28 = vpop.permute.xlu1 %992 }
 0xd61   :  { %v995_v29 = vmul.f32 %v2529_v15, %v993_v28 }
 0xd63   :  { %997 = vrot.lane.b32.xlu0 %v995_v29, %s2595_s21 }
 0xd67   :  { %1104 = vrot.lane.b32.xlu0 %v995_v29, %s2596_s16 }
 0xdd1   :  { %v1002_v31 = vpop.permute.xlu1 %1001 }
 0xdd5   :  { %v998_v33 = vpop.permute.xlu0 %997 }
 0xdd6   :  { %v1004_v34 = vsel %vm160_vm3, %v998_v33, %v1002_v31 }
 0xdd7   :  { %2167 = vmatmul.mubr.msk.f32.vlgmr.msra.gmra.mrb[8].mxu1 %vm168_vm4, %v1004_v34 }
 0xdd8   :  { %2410 = vmatpush3.bf16.msra.mxu1 %v2654_v5  ;;  %2215 = vmatprep.mubr.msk.f32.mxu1 %vm2592_vm0, %v2593_v4 }
 0xdd9   :  { %v1105_v37 = vpop.permute.xlu0 %1104  ;;  %2411 = vmatprep.subr.bf16.mxu1 %v2591_v0 }
 0xdda   :  { %v1107_v38 = vsel %vm50_vm1, %v1849_v36, %v1105_v37 }
 0xddb   :  { %2182 = vmatmul.mubr.msk.f32.vlgmr.msra.gmra.mrb[10].mxu0 %vm58_vm2, %v1107_v38 }
 0xddc   :  { %2398 = vmatpush3.bf16.msra.mxu0 %v2711_v30  ;;  %2413 = vmatpush3.bf16.msra.mxu1 %v2663_v7 }
 0xddd   :  { %2399 = vmatprep.subr.bf16.mxu0 %v2591_v0  ;;  %2200 = vmatprep.mubr.msk.f32.mxu0 %vm2592_vm0, %v2593_v4 }
 0xdde   :  { %2414 = vmatprep.subr.bf16.mxu1 %v2591_v0 }
 0xde0   :  { %2401 = vmatpush3.bf16.msra.mxu0 %v2717_v32  ;;  %2416 = vmatpush3.bf16.msra.mxu1 %v2673_v10 }
 0xde1   :  { %2402 = vmatprep.subr.bf16.mxu0 %v2591_v0  ;;  %2417 = vmatprep.subr.bf16.mxu1 %v2591_v0 }
 0xde4   :  { %2404 = vmatpush3.bf16.msra.mxu0 %v2727_v35 }
 0xde5   :  { %2405 = vmatprep.subr.bf16.mxu0 %v2591_v0 }
 0xde8   :  { %2407 = vmatpush3.bf16.msra.mxu0 %v2738_v39 }
 0xde9   :  { %2429 = vmatprep.subr.bf16.mxu0 %v2591_v0 }
 0xeaa   :  { %v1074_v40 = vpop.f32.mrb[8].mxu1 }
 0xeab   :  { %v1075_v41 = vadd.f32 %v2773_v47, %v1074_v40  ;;  %v2168_v42 = vpop.f32.mrb[9].mxu1 }
 0xead   :  { %2534 = vtanh.f32 %v1075_v41  ;;  %v1848_v49 = vmul.f32 -1.442695, %v1075_v41 }
 0xeae   :  { %v1177_v43 = vpop.f32.mrb[10].mxu0 }
 0xeaf   :  { %v1178_v44 = vadd.f32 %v2694_v13, %v1177_v43  ;;  %v2183_v45 = vpop.f32.mrb[11].mxu0 }
 0xeb1   :  { %2536 = vtanh.f32 %v1178_v44  ;;  %v1851_v50 = vmul.f32 -1.442695, %v1178_v44 }
 0xeb2   :  { %2538 = vpow2.f32 %v1848_v49 }
 0xeb3   :  { %2540 = vpow2.f32 %v1851_v50 }
 0xeb7   :  { %v2535_v46 = vpop.eup %2534 }
 0xeb8   :  { %1087 = vrot.lane.b32.xlu1 %v2535_v46, %s2594_s20 }
 0xebb   :  { %v2537_v48 = vpop.eup %2536 }
 0xebc   :  { %1190 = vrot.lane.b32.xlu0 %v2537_v48, %s2594_s20  ;;  %v2539_v51 = vpop.eup %2538 }
 0xebd   :  { %v1081_v52 = vadd.f32 1.0, %v2539_v51  ;;  %v2541_v53 = vpop.eup %2540 }
 0xebe   :  { %v1184_v54 = vadd.f32 1.0, %v2541_v53 }
 0xebf   :  { %2542 = vrcp.f32 %v1081_v52 }
 0xec0   :  { %2544 = vrcp.f32 %v1184_v54 }
 0xec9   :  { %v2543_v55 = vpop.eup %2542 }
 0xeca   :  { %v2545_v58 = vpop.eup %2544  ;;  %v1085_v61 = vmul.f32 %v2543_v55, %v2913_v20 }
 0xecb   :  { %v1188_v1 = vmul.f32 %v2545_v58, %v2917_v23 }
 0xf2a   :  { %v1088_v56 = vpop.permute.xlu1 %1087 }
 0xf2b   :  { %v1090_v57 = vmul.f32 %v2543_v55, %v1088_v56 }
 0xf2d   :  { %1092 = vrot.lane.b32.xlu1 %v1090_v57, %s2595_s21  ;;  %v1859_v57 = vld [vmem:[%s3077_s0 + $0x38] sm:$0xff] }
 0xf2e   :  { %v1191_v59 = vpop.permute.xlu0 %1190 }
 0xf2f   :  { %v1193_v60 = vmul.f32 %v2545_v58, %v1191_v59 }
 0xf31   :  { %1195 = vrot.lane.b32.xlu0 %v1193_v60, %s2595_s21 }
 0xf9f   :  { %v1093_v62 = vpop.permute.xlu1 %1092 }
 0xfa0   :  { %v2957_v63 = vadd.f32 %v1093_v62, %v1085_v61 }
 0xfa2   :  { %2546 = vtanh.f32 %v2957_v63 }
 0xfa3   :  { %v1196_v2 = vpop.permute.xlu0 %1195 }
 0xfa4   :  { %v2961_v3 = vadd.f32 %v1196_v2, %v1188_v1 }
 0xfa6   :  { %2548 = vtanh.f32 %v2961_v3 }
 0xfac   :  { %v2547_v6 = vpop.eup %2546 }
 0xfad   :  { %1098 = vrot.lane.b32.xlu1 %v2547_v6, %s2594_s20 }
 0xfb0   :  { %v2549_v8 = vpop.eup %2548 }
 0xfb1   :  { %1201 = vrot.lane.b32.xlu0 %v2549_v8, %s2594_s20 }
0x101f   :  { %v1099_v9 = vpop.permute.xlu1 %1098 }
0x1020   :  { %v1101_v11 = vmul.f32 %v2543_v55, %v1099_v9 }
0x1022   :  { %1210 = vrot.lane.b32.xlu0 %v1101_v11, %s2594_s20 }
0x1023   :  { %v1202_v12 = vpop.permute.xlu0 %1201 }
0x1024   :  { %v1204_v14 = vmul.f32 %v2545_v58, %v1202_v12 }
0x1026   :  { %1206 = vrot.lane.b32.xlu1 %v1204_v14, %s2595_s21 }
0x102a   :  { %1313 = vrot.lane.b32.xlu1 %v1204_v14, %s2596_s16 }
0x1094   :  { %v1211_v15 = vpop.permute.xlu0 %1210 }
0x1098   :  { %v1207_v16 = vpop.permute.xlu1 %1206 }
0x1099   :  { %v1213_v17 = vsel %vm160_vm3, %v1207_v16, %v1211_v15 }
0x109a   :  { %2201 = vmatmul.mubr.msk.f32.vlgmr.msra.gmra.mrb[12].mxu0 %vm168_vm4, %v1213_v17 }
0x109b   :  { %2431 = vmatpush3.bf16.msra.mxu0 %v2654_v5  ;;  %2249 = vmatprep.mubr.msk.f32.mxu0 %vm2592_vm0, %v2593_v4 }
0x109c   :  { %v1314_v19 = vpop.permute.xlu1 %1313  ;;  %2432 = vmatprep.subr.bf16.mxu0 %v2591_v0 }
0x109d   :  { %v1316_v20 = vsel %vm50_vm1, %v1854_v18, %v1314_v19 }
0x109e   :  { %2216 = vmatmul.mubr.msk.f32.vlgmr.msra.gmra.mrb[10].mxu1 %vm58_vm2, %v1316_v20 }
0x109f   :  { %2419 = vmatpush3.bf16.msra.mxu1 %v2711_v30  ;;  %2434 = vmatpush3.bf16.msra.mxu0 %v2663_v7 }
0x10a0   :  { %2420 = vmatprep.subr.bf16.mxu1 %v2591_v0  ;;  %2234 = vmatprep.mubr.msk.f32.mxu1 %vm2592_vm0, %v2593_v4 }
0x10a1   :  { %2435 = vmatprep.subr.bf16.mxu0 %v2591_v0 }
0x10a3   :  { %2422 = vmatpush3.bf16.msra.mxu1 %v2717_v32  ;;  %2437 = vmatpush3.bf16.msra.mxu0 %v2673_v10 }
0x10a4   :  { %2423 = vmatprep.subr.bf16.mxu1 %v2591_v0  ;;  %2438 = vmatprep.subr.bf16.mxu0 %v2591_v0 }
0x10a7   :  { %2425 = vmatpush3.bf16.msra.mxu1 %v2727_v35 }
0x10a8   :  { %2426 = vmatprep.subr.bf16.mxu1 %v2591_v0 }
0x10ab   :  { %2428 = vmatpush3.bf16.msra.mxu1 %v2738_v39 }
0x10ac   :  { %2450 = vmatprep.subr.bf16.mxu1 %v2591_v0 }
0x116d   :  { %v1283_v5 = vpop.f32.mrb[12].mxu0 }
0x116e   :  { %v1284_v7 = vadd.f32 %v2773_v47, %v1283_v5  ;;  %v2202_v21 = vpop.f32.mrb[13].mxu0 }
0x1170   :  { %2550 = vtanh.f32 %v1284_v7  ;;  %v1853_v26 = vmul.f32 -1.442695, %v1284_v7 }
0x1171   :  { %v1386_v22 = vpop.f32.mrb[10].mxu1 }
0x1172   :  { %v1387_v10 = vadd.f32 %v2694_v13, %v1386_v22  ;;  %v2217_v23 = vpop.f32.mrb[11].mxu1 }
0x1174   :  { %2552 = vtanh.f32 %v1387_v10  ;;  %v1856_v27 = vmul.f32 -1.442695, %v1387_v10 }
0x1175   :  { %2554 = vpow2.f32 %v1853_v26 }
0x1176   :  { %2556 = vpow2.f32 %v1856_v27 }
0x117a   :  { %v2551_v24 = vpop.eup %2550 }
0x117b   :  { %1296 = vrot.lane.b32.xlu0 %v2551_v24, %s2594_s20 }
0x117e   :  { %v2553_v25 = vpop.eup %2552 }
0x117f   :  { %1399 = vrot.lane.b32.xlu1 %v2553_v25, %s2594_s20  ;;  %v2555_v28 = vpop.eup %2554 }
0x1180   :  { %v1290_v29 = vadd.f32 1.0, %v2555_v28  ;;  %v2557_v31 = vpop.eup %2556 }
0x1181   :  { %v1393_v33 = vadd.f32 1.0, %v2557_v31 }
0x1182   :  { %2558 = vrcp.f32 %v1290_v29 }
0x1183   :  { %2560 = vrcp.f32 %v1393_v33 }
0x118c   :  { %v2559_v34 = vpop.eup %2558 }
0x118d   :  { %v2561_v37 = vpop.eup %2560  ;;  %v1294_v41 = vmul.f32 %v2559_v34, %v2957_v63 }
0x118e   :  { %v1397_v44 = vmul.f32 %v2561_v37, %v2961_v3 }
0x11ed   :  { %v1297_v13 = vpop.permute.xlu0 %1296 }
0x11ee   :  { %v1299_v36 = vmul.f32 %v2559_v34, %v1297_v13 }
0x11f0   :  { %1301 = vrot.lane.b32.xlu0 %v1299_v36, %s2595_s21 }
0x11f1   :  { %v1400_v38 = vpop.permute.xlu1 %1399 }
0x11f2   :  { %v1402_v40 = vmul.f32 %v2561_v37, %v1400_v38 }
0x11f4   :  { %1404 = vrot.lane.b32.xlu1 %v1402_v40, %s2595_s21 }
0x1262   :  { %v1302_v42 = vpop.permute.xlu0 %1301 }
0x1263   :  { %v3001_v43 = vadd.f32 %v1302_v42, %v1294_v41 }
0x1265   :  { %2562 = vtanh.f32 %v3001_v43 }
0x1266   :  { %v1405_v45 = vpop.permute.xlu1 %1404 }
0x1267   :  { %v3005_v46 = vadd.f32 %v1405_v45, %v1397_v44 }
0x1269   :  { %2564 = vtanh.f32 %v3005_v46 }
0x126f   :  { %v2563_v48 = vpop.eup %2562 }
0x1270   :  { %1307 = vrot.lane.b32.xlu0 %v2563_v48, %s2594_s20  ;;  %v46_v48 = vld [vmem:[%s3081_s5 + $0x10] sm:$0xff] }
0x1273   :  { %v2565_v49 = vpop.eup %2564 }
0x1274   :  { %1410 = vrot.lane.b32.xlu1 %v2565_v49, %s2594_s20 }
0x12e2   :  { %v1308_v50 = vpop.permute.xlu0 %1307 }
0x12e3   :  { %v1310_v51 = vmul.f32 %v2559_v34, %v1308_v50  ;;  %v47_v50 = vld [vmem:[%s3081_s5 + $0x18] sm:$0xff] }
0x12e5   :  { %1419 = vrot.lane.b32.xlu1 %v1310_v51, %s2594_s20  ;;  %v2454_v51 = vpack.c.bf16 %v47_v50, %v46_v48 }
0x12e6   :  { %v1411_v52 = vpop.permute.xlu1 %1410 }
0x12e7   :  { %v1413_v53 = vmul.f32 %v2561_v37, %v1411_v52 }
0x12e9   :  { %1415 = vrot.lane.b32.xlu0 %v1413_v53, %s2595_s21 }
0x12ed   :  { %1522 = vrot.lane.b32.xlu0 %v1413_v53, %s2596_s16 }
0x1357   :  { %v1420_v54 = vpop.permute.xlu1 %1419 }
0x135b   :  { %v1416_v55 = vpop.permute.xlu0 %1415 }
0x135c   :  { %v1422_v56 = vsel %vm160_vm3, %v1416_v55, %v1420_v54 }
0x135d   :  { %2235 = vmatmul.mubr.msk.f32.vlgmr.msra.gmra.mrb[12].mxu1 %vm168_vm4, %v1422_v56 }
0x135e   :  { %2279 = vmatprep.mubr.msk.f32.mxu1 %vm2592_vm0, %v2593_v4 }
0x135f   :  { %v1523_v58 = vpop.permute.xlu0 %1522 }
0x1360   :  { %v1525_v59 = vsel %vm50_vm1, %v1859_v57, %v1523_v58 }
0x1361   :  { %2250 = vmatmul.mubr.msk.f32.vlgmr.msra.gmra.mrb[14].mxu0 %vm58_vm2, %v1525_v59 }
0x1362   :  { %2440 = vmatpush3.bf16.msra.mxu0 %v2711_v30  ;;  %2268 = vmatprep.mubr.msk.f32.mxu0 %vm2592_vm0, %v2593_v4  ;;  %v2590_v4 = vld [vmem:[%s3078_s2] ss:$0 sm:$0xff] }
0x1363   :  { %2441 = vmatprep.subr.bf16.mxu0 %v2591_v0 }
0x1366   :  { %2443 = vmatpush3.bf16.msra.mxu0 %v2717_v32 }
0x1367   :  { %2444 = vmatprep.subr.bf16.mxu0 %v2591_v0 }
0x136a   :  { %2446 = vmatpush3.bf16.msra.mxu0 %v2727_v35 }
0x136b   :  { %2447 = vmatprep.subr.bf16.mxu0 %v2591_v0 }
0x136e   :  { %2449 = vmatpush3.bf16.msra.mxu0 %v2738_v39 }
0x1430   :  { %v1492_v60 = vpop.f32.mrb[12].mxu1 }
0x1431   :  { %v1493_v61 = vadd.f32 %v2773_v47, %v1492_v60  ;;  %v2236_v62 = vpop.f32.mrb[13].mxu1 }
0x1433   :  { %2566 = vtanh.f32 %v1493_v61  ;;  %v1858_v39 = vmul.f32 -1.442695, %v1493_v61 }
0x1434   :  { %v1595_v30 = vpop.f32.mrb[14].mxu0 }
0x1435   :  { %v1596_v63 = vadd.f32 %v2590_v4, %v1595_v30  ;;  %v2251_v32 = vpop.f32.mrb[15].mxu0 }
0x1437   :  { %2568 = vtanh.f32 %v1596_v63  ;;  %v1861_v2 = vmul.f32 -1.442695, %v1596_v63 }
0x1438   :  { %2570 = vpow2.f32 %v1858_v39 }
0x1439   :  { %2572 = vpow2.f32 %v1861_v2 }
0x143d   :  { %v2567_v1 = vpop.eup %2566 }
0x143e   :  { %1505 = vrot.lane.b32.xlu1 %v2567_v1, %s2594_s20 }
0x1441   :  { %v2569_v35 = vpop.eup %2568 }
0x1442   :  { %1608 = vrot.lane.b32.xlu0 %v2569_v35, %s2594_s20  ;;  %v2571_v3 = vpop.eup %2570 }
0x1443   :  { %v1499_v6 = vadd.f32 1.0, %v2571_v3  ;;  %v2573_v8 = vpop.eup %2572 }
0x1444   :  { %v1602_v9 = vadd.f32 1.0, %v2573_v8 }
0x1445   :  { %2574 = vrcp.f32 %v1499_v6 }
0x1446   :  { %2576 = vrcp.f32 %v1602_v9 }
0x144f   :  { %v2575_v11 = vpop.eup %2574 }
0x1450   :  { %v2577_v15 = vpop.eup %2576  ;;  %v1503_v18 = vmul.f32 %v2575_v11, %v3001_v43 }
0x1451   :  { %v1606_v5 = vmul.f32 %v2577_v15, %v3005_v46  ;;  %v45_v46 = vld [vmem:[%s3081_s5 + $0x8] sm:$0xff] }
0x14b0   :  { %v1506_v12 = vpop.permute.xlu1 %1505 }
0x14b1   :  { %v1508_v14 = vmul.f32 %v2575_v11, %v1506_v12 }
0x14b3   :  { %1510 = vrot.lane.b32.xlu1 %v1508_v14, %s2595_s21 }
0x14b4   :  { %v1609_v16 = vpop.permute.xlu0 %1608 }
0x14b5   :  { %v1611_v17 = vmul.f32 %v2577_v15, %v1609_v16 }
0x14b7   :  { %1613 = vrot.lane.b32.xlu0 %v1611_v17, %s2595_s21 }
0x1525   :  { %v1511_v19 = vpop.permute.xlu1 %1510 }
0x1526   :  { %v1513_v20 = vadd.f32 %v1511_v19, %v1503_v18 }
0x1528   :  { %2578 = vtanh.f32 %v1513_v20 }
0x1529   :  { %v1614_v7 = vpop.permute.xlu0 %1613 }
0x152a   :  { %v1616_v21 = vadd.f32 %v1614_v7, %v1606_v5 }
0x152c   :  { %2580 = vtanh.f32 %v1616_v21 }
0x1532   :  { %v2579_v22 = vpop.eup %2578 }
0x1533   :  { %1516 = vrot.lane.b32.xlu1 %v2579_v22, %s2594_s20 }
0x1536   :  { %v2581_v10 = vpop.eup %2580 }
0x1537   :  { %1619 = vrot.lane.b32.xlu0 %v2581_v10, %s2594_s20 }
0x15a5   :  { %v1517_v23 = vpop.permute.xlu1 %1516 }
0x15a6   :  { %v1519_v24 = vmul.f32 %v2575_v11, %v1517_v23 }
0x15a8   :  { %1628 = vrot.lane.b32.xlu0 %v1519_v24, %s2594_s20 }
0x15a9   :  { %v1620_v25 = vpop.permute.xlu0 %1619 }
0x15aa   :  { %v1622_v26 = vmul.f32 %v2577_v15, %v1620_v25 }
0x15ac   :  { %1624 = vrot.lane.b32.xlu1 %v1622_v26, %s2595_s21 }
0x161a   :  { %v1629_v27 = vpop.permute.xlu0 %1628 }
0x161e   :  { %v1625_v28 = vpop.permute.xlu1 %1624 }
0x161f   :  { %v1631_v29 = vsel %vm160_vm3, %v1625_v28, %v1629_v27 }
0x1620   :  { %2269 = vmatmul.mubr.msk.f32.vlgmr.msra.gmra.mrb[16].mxu0 %vm168_vm4, %v1631_v29 }
0x16f3   :  { %v1701_v31 = vpop.f32.mrb[16].mxu0 }
0x16f4   :  { %v1702_v33 = vadd.f32 %v2773_v47, %v1701_v31  ;;  %v2270_v34 = vpop.f32.mrb[17].mxu0  ;;  %v44_v47 = vld [vmem:[%s3081_s5] sm:$0xff] }
0x16f5   :  { %v2451_v49 = vpack.c.bf16 %v45_v46, %v44_v47 }
0x16f6   :  { %2582 = vtanh.f32 %v1702_v33  ;;  %v1863_v36 = vmul.f32 -1.442695, %v1702_v33 }
0x16f7   :  { %2452 = vmatpush3.bf16.msra.mxu1 %v2451_v49 }
0x16f8   :  { %2584 = vpow2.f32 %v1863_v36  ;;  %2453 = vmatprep.subr.bf16.mxu1 %v2591_v0  ;;  %v1864_v0 = vld [vmem:[%s3083_s6] ss:$0 sm:$0xff] }
0x16fb   :  { %2455 = vmatpush3.bf16.msra.mxu1 %v2454_v51 }
0x1700   :  { %v2583_v13 = vpop.eup %2582 }
0x1701   :  { %1714 = vrot.lane.b32.xlu1 %v2583_v13, %s2594_s20 }
0x1702   :  { %v2585_v37 = vpop.eup %2584 }
0x1703   :  { %v1708_v38 = vadd.f32 1.0, %v2585_v37 }
0x1705   :  { %2586 = vrcp.f32 %v1708_v38 }
0x170f   :  { %v2587_v40 = vpop.eup %2586 }
0x1710   :  { %v1712_v43 = vmul.f32 %v2587_v40, %v1513_v20 }
0x1773   :  { %v1715_v41 = vpop.permute.xlu1 %1714 }
0x1774   :  { %v1717_v42 = vmul.f32 %v2587_v40, %v1715_v41 }
0x1776   :  { %1719 = vrot.lane.b32.xlu0 %v1717_v42, %s2595_s21 }
0x17e8   :  { %v1720_v44 = vpop.permute.xlu0 %1719 }
0x17e9   :  { %v1722_v45 = vadd.f32 %v1720_v44, %v1712_v43 }
0x17eb   :  { %2588 = vtanh.f32 %v1722_v45 }
0x17f5   :  { %v2589_v52 = vpop.eup %2588 }
0x17f6   :  { %1725 = vrot.lane.b32.xlu1 %v2589_v52, %s2594_s20 }
0x1868   :  { %v1726_v53 = vpop.permute.xlu1 %1725 }
0x1869   :  { %v1728_v54 = vmul.f32 %v2587_v40, %v1726_v53 }
0x186b   :  { %v1729_v55 = vmax.f32 %v1728_v54, 0.0 }
0x186d   :  { %1731 = vrot.lane.b32.xlu0 %v1729_v55, %s2595_s21 }
0x18df   :  { %v1732_v56 = vpop.permute.xlu0 %1731 }
0x18e0   :  { %1734 = vst.msk [vmem:[%s3082_s8] sm:$0xff] %vm160_vm3, %v1732_v56  ;;  %2280 = vmatmul.mubr.msk.f32.vlgmr.msra.gmra.mrb[14].mxu1 %vm160_vm3, %v1732_v56 }
0x19b3   :  { %v1809_v57 = vpop.f32.mrb[14].mxu1 }
0x19b4   :  { %v1810_v58 = vadd.f32 %v1864_v0, %v1809_v57  ;;  %v2281_v59 = vpop.f32.mrb[15].mxu1 }
0x19b6   :  { %1814 = vst.msk [vmem:[%s3084_s7] sm:$0xff] %vm1813_vm5, %v1810_v58 }

</bundles_post_ra>
